<compile_context>
chip_gen: v5e
topology: v5e:2x2
jax: 0.10.0
libtpu: 0.0.40
codegen_flags: <defaults>
</compile_context>

<pallas_src>
import functools

import jax
import jax.numpy as jnp
import numpy as np
from jax.experimental import pallas as pl
from jax.experimental.pallas import tpu as pltpu

LANE = 128  # TPU lane width


def _round_up(x, m):
    return (x + m - 1) // m * m


def _vmem_limit_bytes(*buffer_bytes):
    """Conservative VMEM limit: double-buffer everything, add headroom."""
    needed = 2 * sum(int(b) for b in buffer_bytes)
    return int(min(48 << 20, max(2 * needed + (2 << 20), 16 << 20)))


# --------------------- kernel 1: support = X @ W (row-tiled) ----------------
def _xw_kernel(x_ref, w_ref, out_ref):
    # bf16 operands -> MXU, f32 accumulate, store bf16.
    out_ref[...] = jnp.dot(
        x_ref[...], w_ref[...], preferred_element_type=jnp.float32
    ).astype(out_ref.dtype)


def _xw_matmul(x, w, *, tile_m, out_dtype):
    """out = X @ W with X row-tiled and W VMEM-resident (F is small)."""
    Np, Fp = x.shape
    _, Hp = w.shape
    elt = np.dtype(x.dtype).itemsize
    vmem_limit = _vmem_limit_bytes(
        tile_m * Fp * elt,
        Fp * Hp * elt,
        tile_m * Hp * np.dtype(out_dtype).itemsize,
    )
    return pl.pallas_call(
        _xw_kernel,
        out_shape=jax.ShapeDtypeStruct((Np, Hp), out_dtype),
        grid_spec=pltpu.PrefetchScalarGridSpec(
            num_scalar_prefetch=0,
            grid=(Np // tile_m,),
            in_specs=[
                pl.BlockSpec((tile_m, Fp), lambda i: (i, 0)),  # X row tile
                pl.BlockSpec((Fp, Hp), lambda i: (0, 0)),      # W resident
            ],
            out_specs=pl.BlockSpec((tile_m, Hp), lambda i: (i, 0)),
        ),
        compiler_params=pltpu.CompilerParams(
            dimension_semantics=("parallel",),
            vmem_limit_bytes=vmem_limit,
        ),
    )(x, w)


# ------------- kernel 2/3: out = act(A @ S) [@ W_next] (tiled spmm) ---------
def _aggregate_kernel(*refs, apply_relu, fuse_next_w):
    """Grid = (i: row tile of A/out, k: contraction tile over A cols / S rows).

    Refs (in order):
      a_ref  : (tm, tk)  bf16   A[i, k] tile
      s_ref  : (tk, Hp)  bf16   support row tile
      w_ref  : (Hp, Op)  bf16   next-layer weight (only if fuse_next_w)
      out_ref: (tm, Hp|Op)      output row tile
      acc_ref: (tm, Hp)  f32    VMEM accumulator (persists across k)
    """
    if fuse_next_w:
        a_ref, s_ref, w_ref, out_ref, acc_ref = refs
    else:
        a_ref, s_ref, out_ref, acc_ref = refs

    k = pl.program_id(1)

    @pl.when(k == 0)
    def _():
        acc_ref[...] = jnp.zeros_like(acc_ref)

    # acc += A[i, k] @ S[k]   (bf16 MXU, f32 accumulate)
    acc_ref[...] += jnp.dot(a_ref[...], s_ref[...],
                            preferred_element_type=jnp.float32)

    @pl.when(k == pl.num_programs(1) - 1)
    def _():
        result = acc_ref[...]
        if apply_relu:
            result = jnp.maximum(result, 0.0)  # f32 VPU (v5e-safe)
        if fuse_next_w:
            # Fused next-layer feature transform: (relu(A@S)) @ W_next.
            result = jnp.dot(result.astype(w_ref.dtype), w_ref[...],
                             preferred_element_type=jnp.float32)
        out_ref[...] = result.astype(out_ref.dtype)


def _aggregate(a, s, w_next, *, tile_m, tile_k, apply_relu, out_dtype):
    """out = act(A @ S) optionally followed by @ W_next, f32 accumulation."""
    Np, _ = a.shape
    _, Hp = s.shape
    out_cols = Hp if w_next is None else w_next.shape[1]

    elt = np.dtype(a.dtype).itemsize
    bufs = [
        tile_m * tile_k * elt,                                # A tile
        tile_k * Hp * elt,                                    # S tile
        tile_m * out_cols * np.dtype(out_dtype).itemsize,     # out tile
        tile_m * Hp * 4,                                      # f32 acc scratch
    ]
    if w_next is not None:
        bufs.append(w_next.size * np.dtype(w_next.dtype).itemsize)
    vmem_limit = _vmem_limit_bytes(*bufs)

    kernel = functools.partial(_aggregate_kernel, apply_relu=apply_relu,
                               fuse_next_w=w_next is not None)

    in_specs = [
        pl.BlockSpec((tile_m, tile_k), lambda i, k: (i, k)),  # A tile
        pl.BlockSpec((tile_k, Hp), lambda i, k: (k, 0)),      # S row tile
    ]
    operands = [a, s]
    if w_next is not None:
        Wr, Wc = w_next.shape
        in_specs.append(pl.BlockSpec((Wr, Wc), lambda i, k: (0, 0)))  # resident
        operands.append(w_next)

    return pl.pallas_call(
        kernel,
        out_shape=jax.ShapeDtypeStruct((Np, out_cols), out_dtype),
        grid_spec=pltpu.PrefetchScalarGridSpec(
            num_scalar_prefetch=0,
            grid=(Np // tile_m, Np // tile_k),
            in_specs=in_specs,
            out_specs=pl.BlockSpec((tile_m, out_cols), lambda i, k: (i, 0)),
            scratch_shapes=[pltpu.VMEM((tile_m, Hp), jnp.float32)],
        ),
        compiler_params=pltpu.CompilerParams(
            dimension_semantics=("parallel", "arbitrary"),
            vmem_limit_bytes=vmem_limit,
        ),
    )(*operands)


# ------------------------------- full forward -------------------------------
def _pad2(x, rows, cols, dtype):
    r, c = x.shape
    out = jnp.zeros((rows, cols), dtype)
    return out.at[:r, :c].set(x.astype(dtype))


def gcn_forward(adjacency, features, w1, w2, *, tile=256):
    """Full GCN forward:  A @ relu(A @ (X @ W1)) @ W2  (dense spmm semantics)."""
    N = adjacency.shape[0]
    F = features.shape[1]
    H = w1.shape[1]
    O = w2.shape[1]

    # Tile of the adjacency (rows & contraction). Multiple of 128 so bf16
    # (16,128) block alignment holds; don't over-pad tiny graphs past 128.
    tile = max(128, min(tile, _round_up(N, 128)))
    Np = _round_up(N, tile)
    Fp = _round_up(F, LANE)
    Hp = _round_up(H, LANE)
    Op = _round_up(O, LANE)

    cdtype = jnp.bfloat16  # MXU operand dtype
    a_p = _pad2(adjacency, Np, Np, cdtype)
    x_p = _pad2(features, Np, Fp, cdtype)
    w1_p = _pad2(w1, Fp, Hp, cdtype)
    w2_p = _pad2(w2, Hp, Op, cdtype)

    # 1) support1 = X @ W1   (computed once per row tile, W1 resident).
    support1 = _xw_matmul(x_p, w1_p, tile_m=tile, out_dtype=cdtype)

    # 2) support2 = ReLU(A @ support1) @ W2   (layer-1 aggregation fused with
    #    the layer-2 feature transform: `hidden` never touches HBM).
    support2 = _aggregate(a_p, support1, w2_p, tile_m=tile, tile_k=tile,
                          apply_relu=True, out_dtype=cdtype)

    # 3) out = A @ support2   (final output in f32).
    out_p = _aggregate(a_p, support2, None, tile_m=tile, tile_k=tile,
                       apply_relu=False, out_dtype=jnp.float32)

    return out_p[:N, :O]


def init_gcn_params(key, input_size, hidden_size, output_size):
    """Deterministic re-implementation of GraphConvolution.reset_parameters:
    uniform(-stdv, stdv) with stdv = 1/sqrt(output_size of that layer)."""
    k1, k2 = jax.random.split(key)
    stdv1 = 1.0 / np.sqrt(hidden_size)
    stdv2 = 1.0 / np.sqrt(output_size)
    w1 = jax.random.uniform(k1, (input_size, hidden_size),
                            minval=-stdv1, maxval=stdv1, dtype=jnp.float32)
    w2 = jax.random.uniform(k2, (hidden_size, output_size),
                            minval=-stdv2, maxval=stdv2, dtype=jnp.float32)
    return w1, w2


if __name__ == "__main__":
    # Non-aligned small shapes to exercise padding + tiling:
    # N=300 nodes, input=70, hidden=96, output=40  ->  padded N=512 (2x2 grid
    # of 256-tiles in the aggregation kernels), feature/hidden/output dims
    # padded to 128.
    N, INPUT, HIDDEN, OUTPUT = 300, 70, 96, 40

    key = jax.random.PRNGKey(0)
    k_adj, k_feat, k_param = jax.random.split(key, 3)

    # Symmetric, row-normalized adjacency (typical GCN input).
    a_raw = jax.random.uniform(k_adj, (N, N), dtype=jnp.float32)
    a_sym = 0.5 * (a_raw + a_raw.T) + jnp.eye(N, dtype=jnp.float32)
    adjacency = a_sym / jnp.sum(a_sym, axis=1, keepdims=True)

    features = jax.random.normal(k_feat, (N, INPUT), dtype=jnp.float32)
    w1, w2 = init_gcn_params(k_param, INPUT, HIDDEN, OUTPUT)

    gcn_fn = jax.jit(gcn_forward)
    out = gcn_fn(adjacency, features, w1, w2)
    jax.block_until_ready(out)

    # Reference 1: pure-JAX emulation of the kernel's exact math
    # (bf16 MXU operands, f32 accumulation) -> tight tolerance.
    bf16 = jnp.bfloat16

    def mm(a, b):
        return jnp.dot(a.astype(bf16), b.astype(bf16),
                       preferred_element_type=jnp.float32)

    support1 = mm(features, w1).astype(bf16)
    hidden_ref = jnp.maximum(mm(adjacency, support1), 0.0).astype(bf16)
    support2 = mm(hidden_ref, w2).astype(bf16)
    ref_bf16 = mm(adjacency, support2)
    np.testing.assert_allclose(np.asarray(out), np.asarray(ref_bf16),
                               rtol=1e-3, atol=1e-5)

    # Reference 2: full-f32 module semantics -> loose sanity check
    # (bounds bf16 rounding error of the MXU-friendly path).
    hidden_f32 = jnp.maximum(adjacency @ (features @ w1), 0.0)
    ref_f32 = adjacency @ (hidden_f32 @ w2)
    rel = float(jnp.linalg.norm(out - ref_f32) /
                (jnp.linalg.norm(ref_f32) + 1e-12))
    assert rel < 5e-2, f"relative error vs f32 reference too large: {rel}"

    print("KERNEL_OK")
</pallas_src>

<mosaic_0001>
module attributes {stable_mosaic.version = 11 : i64} {
  func.func @_xw_kernel(%arg0: i32, %arg1: memref<256x128xbf16, #tpu.memory_space<vmem>>, %arg2: memref<128x128xbf16, #tpu.memory_space<vmem>>, %arg3: memref<256x128xbf16, #tpu.memory_space<vmem>>) attributes {dimension_semantics = [#tpu.dimension_semantics<parallel>], iteration_bounds = array<i64: 2>, scalar_prefetch = 0 : i64, scratch_operands = 0 : i64, tpu.core_type = #tpu.core_type<tc>, window_params = [{transform_indices = @transform_0, window_bounds = array<i64: 256, 128>}, {pipeline_mode = #tpu.pipeline_mode<synchronous>, transform_indices = @transform_1, window_bounds = array<i64: 128, 128>}, {transform_indices = @transform_2, window_bounds = array<i64: 256, 128>}]} {
    %c0 = arith.constant 0 : index
    %c0_0 = arith.constant 0 : index
    %0 = vector.load %arg1[%c0, %c0_0] : memref<256x128xbf16, #tpu.memory_space<vmem>>, vector<256x128xbf16>
    %c0_1 = arith.constant 0 : index
    %c0_2 = arith.constant 0 : index
    %1 = vector.load %arg2[%c0_1, %c0_2] : memref<128x128xbf16, #tpu.memory_space<vmem>>, vector<128x128xbf16>
    %cst = arith.constant dense<0.000000e+00> : vector<256x128xf32>
    %2 = tpu.matmul %0, %1, %cst {dimension_numbers = #tpu.dot_dimension_numbers<[1], [0], [0], [1], [0, 0, 1, 1], [], []>} : vector<256x128xbf16>, vector<128x128xbf16>, vector<256x128xf32> -> vector<256x128xf32>
    %3 = arith.truncf %2 : vector<256x128xf32> to vector<256x128xbf16>
    %c0_3 = arith.constant 0 : index
    %c0_4 = arith.constant 0 : index
    %4 = vector.load %arg3[%c0_3, %c0_4] : memref<256x128xbf16, #tpu.memory_space<vmem>>, vector<256x128xbf16>
    tpu.vector_store %arg3[%c0_3, %c0_4], %3 {strides = array<i32>} : memref<256x128xbf16, #tpu.memory_space<vmem>>, vector<256x128xbf16>,
    return
  }
  func.func @transform_0(%arg0: i32) -> (i32, i32) {
    %c0_i32 = arith.constant 0 : i32
    %c0_i32_0 = arith.constant 0 : i32
    return %arg0, %c0_i32 : i32, i32
  }
  func.func @transform_1(%arg0: i32) -> (i32, i32) {
    %c0_i32 = arith.constant 0 : i32
    %c0_i32_0 = arith.constant 0 : i32
    %c0_i32_1 = arith.constant 0 : i32
    return %c0_i32, %c0_i32_0 : i32, i32
  }
  func.func @transform_2(%arg0: i32) -> (i32, i32) {
    %c0_i32 = arith.constant 0 : i32
    %c0_i32_0 = arith.constant 0 : i32
    return %arg0, %c0_i32 : i32, i32
  }
}

module attributes {stable_mosaic.version = 11 : i64} {
  func.func @_aggregate_kernel(%arg0: i32, %arg1: i32, %arg2: memref<256x256xbf16, #tpu.memory_space<vmem>>, %arg3: memref<256x128xbf16, #tpu.memory_space<vmem>>, %arg4: memref<256x128xf32, #tpu.memory_space<vmem>>, %arg5: memref<256x128xf32, #tpu.memory_space<vmem>>) attributes {dimension_semantics = [#tpu.dimension_semantics<parallel>, #tpu.dimension_semantics<arbitrary>], iteration_bounds = array<i64: 2, 2>, scalar_prefetch = 0 : i64, scratch_operands = 1 : i64, tpu.core_type = #tpu.core_type<tc>, window_params = [{transform_indices = @transform_0, window_bounds = array<i64: 256, 256>}, {transform_indices = @transform_1, window_bounds = array<i64: 256, 128>}, {transform_indices = @transform_2, window_bounds = array<i64: 256, 128>}]} {
    %c0_i32 = arith.constant 0 : i32
    %0 = arith.cmpi eq, %arg1, %c0_i32 : i32
    %1 = arith.extui %0 : i1 to i32
    %c0_i32_0 = arith.constant 0 : i32
    %2 = arith.cmpi ne, %1, %c0_i32_0 : i32
    scf.if %2 {
      %cst_9 = arith.constant 0.000000e+00 : f32
      %12 = vector.broadcast %cst_9 : f32 to vector<256x128xf32>
      %c0_10 = arith.constant 0 : index
      %c0_11 = arith.constant 0 : index
      %13 = vector.load %arg5[%c0_10, %c0_11] : memref<256x128xf32, #tpu.memory_space<vmem>>, vector<256x128xf32>
      tpu.vector_store %arg5[%c0_10, %c0_11], %12 {strides = array<i32>} : memref<256x128xf32, #tpu.memory_space<vmem>>, vector<256x128xf32>,
    } else {
    }
    %c0 = arith.constant 0 : index
    %c0_1 = arith.constant 0 : index
    %3 = vector.load %arg5[%c0, %c0_1] : memref<256x128xf32, #tpu.memory_space<vmem>>, vector<256x128xf32>
    %c0_2 = arith.constant 0 : index
    %c0_3 = arith.constant 0 : index
    %4 = vector.load %arg2[%c0_2, %c0_3] : memref<256x256xbf16, #tpu.memory_space<vmem>>, vector<256x256xbf16>
    %c0_4 = arith.constant 0 : index
    %c0_5 = arith.constant 0 : index
    %5 = vector.load %arg3[%c0_4, %c0_5] : memref<256x128xbf16, #tpu.memory_space<vmem>>, vector<256x128xbf16>
    %cst = arith.constant dense<0.000000e+00> : vector<256x128xf32>
    %6 = tpu.matmul %4, %5, %cst {dimension_numbers = #tpu.dot_dimension_numbers<[1], [0], [0], [1], [0, 0, 1, 1], [], []>} : vector<256x256xbf16>, vector<256x128xbf16>, vector<256x128xf32> -> vector<256x128xf32>
    %7 = arith.addf %3, %6 : vector<256x128xf32>
    %c0_6 = arith.constant 0 : index
    %c0_7 = arith.constant 0 : index
    %8 = vector.load %arg5[%c0_6, %c0_7] : memref<256x128xf32, #tpu.memory_space<vmem>>, vector<256x128xf32>
    tpu.vector_store %arg5[%c0_6, %c0_7], %7 {strides = array<i32>} : memref<256x128xf32, #tpu.memory_space<vmem>>, vector<256x128xf32>,
    %c1_i32 = arith.constant 1 : i32
    %9 = arith.cmpi eq, %arg1, %c1_i32 : i32
    %10 = arith.extui %9 : i1 to i32
    %c0_i32_8 = arith.constant 0 : i32
    %11 = arith.cmpi ne, %10, %c0_i32_8 : i32
    scf.if %11 {
      %c0_9 = arith.constant 0 : index
      %c0_10 = arith.constant 0 : index
      %12 = vector.load %arg5[%c0_9, %c0_10] : memref<256x128xf32, #tpu.memory_space<vmem>>, vector<256x128xf32>
      %c0_11 = arith.constant 0 : index
      %c0_12 = arith.constant 0 : index
      %13 = vector.load %arg4[%c0_11, %c0_12] : memref<256x128xf32, #tpu.memory_space<vmem>>, vector<256x128xf32>
      tpu.vector_store %arg4[%c0_11, %c0_12], %12 {strides = array<i32>} : memref<256x128xf32, #tpu.memory_space<vmem>>, vector<256x128xf32>,
    } else {
    }
    return
  }
  func.func @transform_0(%arg0: i32, %arg1: i32) -> (i32, i32) {
    %c0_i32 = arith.constant 0 : i32
    return %arg0, %arg1 : i32, i32
  }
  func.func @transform_1(%arg0: i32, %arg1: i32) -> (i32, i32) {
    %c0_i32 = arith.constant 0 : i32
    %c0_i32_0 = arith.constant 0 : i32
    return %arg1, %c0_i32 : i32, i32
  }
  func.func @transform_2(%arg0: i32, %arg1: i32) -> (i32, i32) {
    %c0_i32 = arith.constant 0 : i32
    %c0_i32_0 = arith.constant 0 : i32
    return %arg0, %c0_i32 : i32, i32
  }
}

module attributes {stable_mosaic.version = 11 : i64} {
  func.func @_aggregate_kernel(%arg0: i32, %arg1: i32, %arg2: memref<256x256xbf16, #tpu.memory_space<vmem>>, %arg3: memref<256x128xbf16, #tpu.memory_space<vmem>>, %arg4: memref<128x128xbf16, #tpu.memory_space<vmem>>, %arg5: memref<256x128xbf16, #tpu.memory_space<vmem>>, %arg6: memref<256x128xf32, #tpu.memory_space<vmem>>) attributes {dimension_semantics = [#tpu.dimension_semantics<parallel>, #tpu.dimension_semantics<arbitrary>], iteration_bounds = array<i64: 2, 2>, scalar_prefetch = 0 : i64, scratch_operands = 1 : i64, tpu.core_type = #tpu.core_type<tc>, window_params = [{transform_indices = @transform_0, window_bounds = array<i64: 256, 256>}, {transform_indices = @transform_1, window_bounds = array<i64: 256, 128>}, {pipeline_mode = #tpu.pipeline_mode<synchronous>, transform_indices = @transform_2, window_bounds = array<i64: 128, 128>}, {transform_indices = @transform_3, window_bounds = array<i64: 256, 128>}]} {
    %c0_i32 = arith.constant 0 : i32
    %0 = arith.cmpi eq, %arg1, %c0_i32 : i32
    %1 = arith.extui %0 : i1 to i32
    %c0_i32_0 = arith.constant 0 : i32
    %2 = arith.cmpi ne, %1, %c0_i32_0 : i32
    scf.if %2 {
      %cst_9 = arith.constant 0.000000e+00 : f32
      %12 = vector.broadcast %cst_9 : f32 to vector<256x128xf32>
      %c0_10 = arith.constant 0 : index
      %c0_11 = arith.constant 0 : index
      %13 = vector.load %arg6[%c0_10, %c0_11] : memref<256x128xf32, #tpu.memory_space<vmem>>, vector<256x128xf32>
      tpu.vector_store %arg6[%c0_10, %c0_11], %12 {strides = array<i32>} : memref<256x128xf32, #tpu.memory_space<vmem>>, vector<256x128xf32>,
    } else {
    }
    %c0 = arith.constant 0 : index
    %c0_1 = arith.constant 0 : index
    %3 = vector.load %arg6[%c0, %c0_1] : memref<256x128xf32, #tpu.memory_space<vmem>>, vector<256x128xf32>
    %c0_2 = arith.constant 0 : index
    %c0_3 = arith.constant 0 : index
    %4 = vector.load %arg2[%c0_2, %c0_3] : memref<256x256xbf16, #tpu.memory_space<vmem>>, vector<256x256xbf16>
    %c0_4 = arith.constant 0 : index
    %c0_5 = arith.constant 0 : index
    %5 = vector.load %arg3[%c0_4, %c0_5] : memref<256x128xbf16, #tpu.memory_space<vmem>>, vector<256x128xbf16>
    %cst = arith.constant dense<0.000000e+00> : vector<256x128xf32>
    %6 = tpu.matmul %4, %5, %cst {dimension_numbers = #tpu.dot_dimension_numbers<[1], [0], [0], [1], [0, 0, 1, 1], [], []>} : vector<256x256xbf16>, vector<256x128xbf16>, vector<256x128xf32> -> vector<256x128xf32>
    %7 = arith.addf %3, %6 : vector<256x128xf32>
    %c0_6 = arith.constant 0 : index
    %c0_7 = arith.constant 0 : index
    %8 = vector.load %arg6[%c0_6, %c0_7] : memref<256x128xf32, #tpu.memory_space<vmem>>, vector<256x128xf32>
    tpu.vector_store %arg6[%c0_6, %c0_7], %7 {strides = array<i32>} : memref<256x128xf32, #tpu.memory_space<vmem>>, vector<256x128xf32>,
    %c1_i32 = arith.constant 1 : i32
    %9 = arith.cmpi eq, %arg1, %c1_i32 : i32
    %10 = arith.extui %9 : i1 to i32
    %c0_i32_8 = arith.constant 0 : i32
    %11 = arith.cmpi ne, %10, %c0_i32_8 : i32
    scf.if %11 {
      %c0_9 = arith.constant 0 : index
      %c0_10 = arith.constant 0 : index
      %12 = vector.load %arg6[%c0_9, %c0_10] : memref<256x128xf32, #tpu.memory_space<vmem>>, vector<256x128xf32>
      %cst_11 = arith.constant 0.000000e+00 : f32
      %13 = vector.broadcast %cst_11 : f32 to vector<256x128xf32>
      %14 = arith.maximumf %12, %13 : vector<256x128xf32>
      %15 = arith.truncf %14 : vector<256x128xf32> to vector<256x128xbf16>
      %c0_12 = arith.constant 0 : index
      %c0_13 = arith.constant 0 : index
      %16 = vector.load %arg4[%c0_12, %c0_13] : memref<128x128xbf16, #tpu.memory_space<vmem>>, vector<128x128xbf16>
      %cst_14 = arith.constant dense<0.000000e+00> : vector<256x128xf32>
      %17 = tpu.matmul %15, %16, %cst_14 {dimension_numbers = #tpu.dot_dimension_numbers<[1], [0], [0], [1], [0, 0, 1, 1], [], []>} : vector<256x128xbf16>, vector<128x128xbf16>, vector<256x128xf32> -> vector<256x128xf32>
      %18 = arith.truncf %17 : vector<256x128xf32> to vector<256x128xbf16>
      %c0_15 = arith.constant 0 : index
      %c0_16 = arith.constant 0 : index
      %19 = vector.load %arg5[%c0_15, %c0_16] : memref<256x128xbf16, #tpu.memory_space<vmem>>, vector<256x128xbf16>
      tpu.vector_store %arg5[%c0_15, %c0_16], %18 {strides = array<i32>} : memref<256x128xbf16, #tpu.memory_space<vmem>>, vector<256x128xbf16>,
    } else {
    }
    return
  }
  func.func @transform_0(%arg0: i32, %arg1: i32) -> (i32, i32) {
    %c0_i32 = arith.constant 0 : i32
    return %arg0, %arg1 : i32, i32
  }
  func.func @transform_1(%arg0: i32, %arg1: i32) -> (i32, i32) {
    %c0_i32 = arith.constant 0 : i32
    %c0_i32_0 = arith.constant 0 : i32
    return %arg1, %c0_i32 : i32, i32
  }
  func.func @transform_2(%arg0: i32, %arg1: i32) -> (i32, i32) {
    %c0_i32 = arith.constant 0 : i32
    %c0_i32_0 = arith.constant 0 : i32
    %c0_i32_1 = arith.constant 0 : i32
    return %c0_i32, %c0_i32_0 : i32, i32
  }
  func.func @transform_3(%arg0: i32, %arg1: i32) -> (i32, i32) {
    %c0_i32 = arith.constant 0 : i32
    %c0_i32_0 = arith.constant 0 : i32
    return %arg0, %c0_i32 : i32, i32
  }
}

</mosaic_0001>

<bundles_post_ra>
// kernel: gcn_forward.3
= control target key start
LH: loop header
LB: loop body
LE: loop exit
PB: predicated region body
PF: predicated region fallthrough
CT: control target
= control target key end

     0   :  { %s829_s9 = smov 0   ;;  %s913_s0 = inlined_call_operand.vmem [shape: bf16[512,128], index: 0, kind: input, shape index: {}]   ;;  %s914_s1 = inlined_call_operand.vmem [shape: bf16[128,128], index: 1, kind: input, shape index: {}]   ;;  %s915_s2 = inlined_call_operand.vmem [shape: bf16[512,128], index: 2, kind: output, shape index: {}]  }
   0x1 LB: > { %s548_s10 = sadd.s32 4294967295, %s812_s9   ;;  %p552_p0 = scmp.ge.s32.totalorder %s812_s9, 1  ;;  %s812_s9 = sphi %s829_s9, %s12_s9  }
   0x2   : > { %p113_p1 = scmp.lt.s32.totalorder %s812_s9, 3 }
   0x4   : > { %p114_p2 = pnand %p552_p0, %p113_p1 }
   0x5   : > { %s553_s19 = sshll.u32 (!%p114_p2), %s548_s10, 5 }
   0x6   : > { %117 = sbr.rel (%p114_p2) target bundleno = 236 (0xec), region = 28  ;;  %p136_p3 = scmp.lt.s32.totalorder (!%p114_p2), %s553_s19, 63 }
   0xb   : > { %v678_v0 = vld [vmem:[%s914_s1 + $0x38] sm:$0xff]  ;;  %v677_v1 = vld [vmem:[%s914_s1 + $0x30] sm:$0xff]  ;;  %v676_v2 = vld [vmem:[%s914_s1 + $0x28] sm:$0xff]  ;;  %s917_s19 = smov (!%p136_p3, %s553_s19), 63 }
   0xc   : > { %339 = vmatpush.bf16.msra.mxu0 %v678_v0  ;;  %774 = vmatpush.bf16.msra.mxu1 %v678_v0  ;;  %v675_v3 = vld [vmem:[%s914_s1 + $0x20] sm:$0xff]  ;;  %v674_v4 = vld [vmem:[%s914_s1 + $0x18] sm:$0xff]  ;;  %v673_v5 = vld [vmem:[%s914_s1 + $0x10] sm:$0xff]  ;;  %s554_s26 = sshll.u32 %s917_s19, 2 }
   0xd   : > { %775 = vmatpush.bf16.msra.mxu2 %v678_v0  ;;  %776 = vmatpush.bf16.msra.mxu3 %v678_v0  ;;  %v672_v6 = vld [vmem:[%s914_s1 + $0x8] sm:$0xff]  ;;  %v671_v7 = vld [vmem:[%s914_s1] sm:$0xff]  ;;  %s869_s3 = scalar_lea.vmem %s913_s0, %s554_s26  ;;  %s892_s6 = scalar_lea.vmem %s915_s2, %s554_s26 }
   0xe   : > { %v655_v8 = vld [vmem:[%s869_s3] sm:$0xff]  ;;  %v656_v12 = vld [vmem:[%s869_s3 + $0x8] sm:$0xff]  ;;  %v657_v16 = vld [vmem:[%s869_s3 + $0x10] sm:$0xff] }
   0xf   : > { %v659_v9 = vld [vmem:[%s869_s3 + $0x20] sm:$0xff]  ;;  %v660_v13 = vld [vmem:[%s869_s3 + $0x28] sm:$0xff]  ;;  %v661_v17 = vld [vmem:[%s869_s3 + $0x30] sm:$0xff] }
  0x10   : > { %340 = vmatpush.bf16.msra.mxu0 %v677_v1  ;;  %777 = vmatpush.bf16.msra.mxu1 %v677_v1  ;;  %v663_v10 = vld [vmem:[%s869_s3 + $0x40] sm:$0xff]  ;;  %v664_v14 = vld [vmem:[%s869_s3 + $0x48] sm:$0xff]  ;;  %v665_v18 = vld [vmem:[%s869_s3 + $0x50] sm:$0xff] }
  0x11   : > { %778 = vmatpush.bf16.msra.mxu2 %v677_v1  ;;  %779 = vmatpush.bf16.msra.mxu3 %v677_v1  ;;  %v667_v11 = vld [vmem:[%s869_s3 + $0x60] sm:$0xff]  ;;  %v668_v15 = vld [vmem:[%s869_s3 + $0x68] sm:$0xff]  ;;  %v669_v19 = vld [vmem:[%s869_s3 + $0x70] sm:$0xff] }
  0x12   : > { %v658_v20 = vld [vmem:[%s869_s3 + $0x18] sm:$0xff] }
  0x13   : > { %v662_v21 = vld [vmem:[%s869_s3 + $0x38] sm:$0xff] }
  0x14   : > { %341 = vmatpush.bf16.msra.mxu0 %v676_v2  ;;  %780 = vmatpush.bf16.msra.mxu1 %v676_v2  ;;  %v666_v22 = vld [vmem:[%s869_s3 + $0x58] sm:$0xff] }
  0x15   : > { %781 = vmatpush.bf16.msra.mxu2 %v676_v2  ;;  %782 = vmatpush.bf16.msra.mxu3 %v676_v2  ;;  %v670_v23 = vld [vmem:[%s869_s3 + $0x78] sm:$0xff] }
  0x18   : > { %342 = vmatpush.bf16.msra.mxu0 %v675_v3  ;;  %783 = vmatpush.bf16.msra.mxu1 %v675_v3 }
  0x19   : > { %784 = vmatpush.bf16.msra.mxu2 %v675_v3  ;;  %785 = vmatpush.bf16.msra.mxu3 %v675_v3 }
  0x1c   : > { %343 = vmatpush.bf16.msra.mxu0 %v674_v4  ;;  %786 = vmatpush.bf16.msra.mxu1 %v674_v4 }
  0x1d   : > { %787 = vmatpush.bf16.msra.mxu2 %v674_v4  ;;  %788 = vmatpush.bf16.msra.mxu3 %v674_v4 }
  0x20   : > { %344 = vmatpush.bf16.msra.mxu0 %v673_v5  ;;  %789 = vmatpush.bf16.msra.mxu1 %v673_v5 }
  0x21   : > { %790 = vmatpush.bf16.msra.mxu2 %v673_v5  ;;  %791 = vmatpush.bf16.msra.mxu3 %v673_v5 }
  0x24   : > { %345 = vmatpush.bf16.msra.mxu0 %v672_v6  ;;  %792 = vmatpush.bf16.msra.mxu1 %v672_v6 }
  0x25   : > { %793 = vmatpush.bf16.msra.mxu2 %v672_v6  ;;  %794 = vmatpush.bf16.msra.mxu3 %v672_v6 }
  0x28   : > { %346 = vmatpush.bf16.msra.mxu0 %v671_v7  ;;  %795 = vmatpush.bf16.msra.mxu1 %v671_v7 }
  0x29   : > { %796 = vmatpush.bf16.msra.mxu2 %v671_v7  ;;  %797 = vmatpush.bf16.msra.mxu3 %v671_v7 }
  0x2b   : > { %347 = vmatmul.bf16.vlgmr.msra.gmra.mxu0 %v655_v8  ;;  %367 = vmatmul.bf16.vlgmr.msra.gmra.mxu1 %v659_v9 }
  0x2c   : > { %387 = vmatmul.bf16.vlgmr.msra.gmra.mxu2 %v663_v10  ;;  %407 = vmatmul.bf16.vlgmr.msra.gmra.mxu3 %v667_v11 }
  0x3b   : > { %352 = vmatmul.bf16.gmra.mxu0 %v656_v12  ;;  %372 = vmatmul.bf16.gmra.mxu1 %v660_v13 }
  0x3c   : > { %392 = vmatmul.bf16.gmra.mxu2 %v664_v14  ;;  %412 = vmatmul.bf16.gmra.mxu3 %v668_v15 }
  0x4b   : > { %357 = vmatmul.bf16.gmra.mxu0 %v657_v16  ;;  %377 = vmatmul.bf16.gmra.mxu1 %v661_v17 }
  0x4c   : > { %397 = vmatmul.bf16.gmra.mxu2 %v665_v18  ;;  %417 = vmatmul.bf16.gmra.mxu3 %v669_v19 }
  0x5b   : > { %362 = vmatmul.bf16.gmra.mxu0 %v658_v20  ;;  %382 = vmatmul.bf16.gmra.mxu1 %v662_v21 }
  0x5c   : > { %402 = vmatmul.bf16.gmra.mxu2 %v666_v22  ;;  %422 = vmatmul.bf16.gmra.mxu3 %v670_v23 }
  0xa8   : > { %v348_v24 = vpop.f32.mrf.mxu0  ;;  %v368_v25 = vpop.f32.mrf.mxu1 }
  0xaf   : > { %v388_v26 = vpop.f32.mrf.mxu2  ;;  %v408_v27 = vpop.f32.mrf.mxu3 }
  0xb0   : > { %v350_v28 = vpop.f32.mrf.mxu0  ;;  %v370_v29 = vpop.f32.mrf.mxu1 }
  0xb1   : > { %v682_v30 = vpack.c.bf16 %v350_v28, %v348_v24  ;;  %v702_v31 = vpack.c.bf16 %v370_v29, %v368_v25 }
  0xb3   : > { %683 = vst [vmem:[%s892_s6] sm:$0xff] %v682_v30  }
  0xb4   : > { %762 = vst [vmem:[%s892_s6 + $0x20] sm:$0xff] %v702_v31  }
  0xb7   : > { %v390_v32 = vpop.f32.mrf.mxu2  ;;  %v410_v33 = vpop.f32.mrf.mxu3 }
  0xb8   : > { %v722_v34 = vpack.c.bf16 %v390_v32, %v388_v26  ;;  %v742_v35 = vpack.c.bf16 %v410_v33, %v408_v27  ;;  %v353_v36 = vpop.f32.mrf.mxu0  ;;  %v373_v37 = vpop.f32.mrf.mxu1 }
  0xba   : > { %766 = vst [vmem:[%s892_s6 + $0x40] sm:$0xff] %v722_v34  }
  0xbb   : > { %770 = vst [vmem:[%s892_s6 + $0x60] sm:$0xff] %v742_v35  }
  0xbf   : > { %v393_v38 = vpop.f32.mrf.mxu2  ;;  %v413_v39 = vpop.f32.mrf.mxu3 }
  0xc0   : > { %v355_v40 = vpop.f32.mrf.mxu0  ;;  %v375_v41 = vpop.f32.mrf.mxu1 }
  0xc1   : > { %v687_v42 = vpack.c.bf16 %v355_v40, %v353_v36  ;;  %v707_v43 = vpack.c.bf16 %v375_v41, %v373_v37 }
  0xc3   : > { %759 = vst [vmem:[%s892_s6 + $0x8] sm:$0xff] %v687_v42  }
  0xc4   : > { %763 = vst [vmem:[%s892_s6 + $0x28] sm:$0xff] %v707_v43  }
  0xc7   : > { %v395_v44 = vpop.f32.mrf.mxu2  ;;  %v415_v45 = vpop.f32.mrf.mxu3 }
  0xc8   : > { %v727_v46 = vpack.c.bf16 %v395_v44, %v393_v38  ;;  %v747_v47 = vpack.c.bf16 %v415_v45, %v413_v39  ;;  %v358_v48 = vpop.f32.mrf.mxu0  ;;  %v378_v49 = vpop.f32.mrf.mxu1 }
  0xca   : > { %767 = vst [vmem:[%s892_s6 + $0x48] sm:$0xff] %v727_v46  }
  0xcb   : > { %771 = vst [vmem:[%s892_s6 + $0x68] sm:$0xff] %v747_v47  }
  0xcf   : > { %v398_v50 = vpop.f32.mrf.mxu2  ;;  %v418_v51 = vpop.f32.mrf.mxu3 }
  0xd0   : > { %v360_v52 = vpop.f32.mrf.mxu0  ;;  %v380_v53 = vpop.f32.mrf.mxu1 }
  0xd1   : > { %v692_v54 = vpack.c.bf16 %v360_v52, %v358_v48  ;;  %v712_v55 = vpack.c.bf16 %v380_v53, %v378_v49 }
  0xd3   : > { %760 = vst [vmem:[%s892_s6 + $0x10] sm:$0xff] %v692_v54  }
  0xd4   : > { %764 = vst [vmem:[%s892_s6 + $0x30] sm:$0xff] %v712_v55  }
  0xd7   : > { %v400_v56 = vpop.f32.mrf.mxu2  ;;  %v420_v57 = vpop.f32.mrf.mxu3 }
  0xd8   : > { %v732_v58 = vpack.c.bf16 %v400_v56, %v398_v50  ;;  %v752_v59 = vpack.c.bf16 %v420_v57, %v418_v51  ;;  %v363_v60 = vpop.f32.mrf.mxu0  ;;  %v383_v61 = vpop.f32.mrf.mxu1 }
  0xda   : > { %768 = vst [vmem:[%s892_s6 + $0x50] sm:$0xff] %v732_v58  }
  0xdb   : > { %772 = vst [vmem:[%s892_s6 + $0x70] sm:$0xff] %v752_v59  }
  0xdf   : > { %v403_v62 = vpop.f32.mrf.mxu2  ;;  %v423_v63 = vpop.f32.mrf.mxu3 }
  0xe0   : > { %v365_v0 = vpop.f32.mrf.mxu0  ;;  %v385_v1 = vpop.f32.mrf.mxu1 }
  0xe1   : > { %v697_v2 = vpack.c.bf16 %v365_v0, %v363_v60  ;;  %v717_v3 = vpack.c.bf16 %v385_v1, %v383_v61 }
  0xe3   : > { %761 = vst [vmem:[%s892_s6 + $0x18] sm:$0xff] %v697_v2  }
  0xe4   : > { %765 = vst [vmem:[%s892_s6 + $0x38] sm:$0xff] %v717_v3  }
  0xe7   : > { %v405_v4 = vpop.f32.mrf.mxu2  ;;  %v425_v5 = vpop.f32.mrf.mxu3 }
  0xe8   : > { %v737_v6 = vpack.c.bf16 %v405_v4, %v403_v62  ;;  %v757_v7 = vpack.c.bf16 %v425_v5, %v423_v63 }
  0xea   : > { %769 = vst [vmem:[%s892_s6 + $0x58] sm:$0xff] %v737_v6  }
  0xeb   : > { %773 = vst [vmem:[%s892_s6 + $0x78] sm:$0xff] %v757_v7  }
  0xec PF: > { %s12_s9 = sadd.s32 1, %s812_s9  }
  0xed   : > { %p9_p4 = scmp.ge.s32.totalorder %s12_s9, 4  }
  0xef   :  { %11 = sbr.rel (!%p9_p4) target bundleno = 1 (0x1), region = 58 }

// kernel: gcn_forward.5
= control target key start
LH: loop header
LB: loop body
LE: loop exit
PB: predicated region body
PF: predicated region fallthrough
CT: control target
= control target key end

     0   :  { %s1538_s9 = smov 0   ;;  %s1540_s10 = smov 0   ;;  %s1818_s0 = inlined_call_operand.vmem [shape: bf16[512,512], index: 0, kind: input, shape index: {}]   ;;  %s1819_s1 = inlined_call_operand.vmem [shape: bf16[512,128], index: 1, kind: input, shape index: {}]   ;;  %s1820_s2 = inlined_call_operand.vmem [shape: f32[512,128], index: 2, kind: output, shape index: {}]  }
   0x1   :  { %s1542_s11 = smov 0   ;;  %s1544_s12 = smov 0  }
   0x2   :  { %s1546_s13 = smov 0   ;;  %s1548_s14 = smov 0  }
   0x3   :  { %s1550_s15 = smov 0  }
   0x4 LB: > { %s21_s16 = sadd.s32 1, %s1512_s13  ;;  %s24_s17 = sadd.s32 1, %s1516_s14  ;;  %s1520_s15 = sphi %s1550_s15, %s12_s15   ;;  %s1516_s14 = sphi %s1548_s14, %s1826_s14   ;;  %s1512_s13 = sphi %s1546_s13, %s1825_s13   ;;  %s1508_s12 = sphi %s1544_s12, %s1824_s12   ;;  %s1504_s11 = sphi %s1542_s11, %s1823_s11   ;;  %s1500_s10 = sphi %s1540_s10, %s1822_s10   ;;  %s1496_s9 = sphi %s1538_s9, %s1821_s9  }
   0x5   : > { %p22_p0 = scmp.ge.s32.totalorder %s21_s16, 2  ;;  %p40_p1 = scmp.ne.s32.totalorder %s1500_s10, %s1496_s9 }
   0x6   : > { %p41_p2 = scmp.eq.s32.totalorder %s1520_s15, 0  ;;  %s33_s21 = sadd.s32 1, %s1500_s10 }
   0x7   : > { %s1828_s16 = smov (%p22_p0, %s21_s16), 0  ;;  %s1830_s17 = smov (!%p22_p0, %s24_s17), %s1516_s14 }
   0x8   : > { %p42_p3 = por %p41_p2, %p40_p1  ;;  %p26_p4 = scmp.ge.s32.totalorder %s1830_s17, 2 }
   0x9   : > { %s29_s18 = ssub.s32 %s1512_s13, %s1828_s16  ;;  %p1136_p6 = scmp.ge.s32.totalorder %s1520_s15, 4 }
   0xa   : > { %s1832_s17 = smov (%p26_p4, %s1830_s17), 0 }
   0xb   : > { %s28_s19 = ssub.s32 %s1516_s14, %s1832_s17  ;;  %118 = sbr.rel (%p1136_p6) target bundleno = 55 (0x37), region = 16 }
   0xc   : > { %s30_s20 = sor.u32 %s29_s18, %s28_s19 }
   0xd   : > { %p31_p5 = scmp.eq.s32.totalorder %s30_s20, 0 }
   0xf   : > { %s1589_s22 = scalar_select %p31_p5, %s1500_s10, %s33_s21  }
  0x10   : > { %121 = sbr.rel (!%p42_p3) target bundleno = 55 (0x37), region = 20  ;;  %s123_s23 = sand.u32 (%p42_p3), 1, %s1500_s10  }
  0x11   : > { %s1139_s24 = sshll.u32 (%p42_p3), %s1512_s13, 1  ;;  %s1137_s25 = sshll.u32 (%p42_p3), %s123_s23, 8 }
  0x12   : > { %s1344_s26 = sshll.u32 (%p42_p3), %s1516_s14, 7  ;;  %s1603_s4 = scalar_lea.vmem (%p42_p3), [#allocation3], %s1137_s25 }
  0x13   : > { %s129_s27 = sadd.s32 (%p42_p3), %s1344_s26, %s1139_s24 }
  0x14   : > { %s1141_s28 = sshll.u32 (%p42_p3), %s129_s27, 2 }
  0x15   : > { %s1598_s3 = scalar_lea.vmem %s1818_s0, %s1141_s28 }
  0x16   : > { %v222_v0 = vld [vmem:[%s1598_s3] sm:$0xff]  ;;  %v224_v1 = vld [vmem:[%s1598_s3 + $0x10] sm:$0xff] }
  0x17   : > { %v226_v2 = vld [vmem:[%s1598_s3 + $0x20] sm:$0xff]  ;;  %223 = vst [vmem:[%s1603_s4] sm:$0xff] %v222_v0  ;;  %v228_v3 = vld [vmem:[%s1598_s3 + $0x30] sm:$0xff] }
  0x18   : > { %225 = vst [vmem:[%s1603_s4 + $0x8] sm:$0xff] %v224_v1  ;;  %v230_v4 = vld [vmem:[%s1598_s3 + $0x40] sm:$0xff]  ;;  %v232_v5 = vld [vmem:[%s1598_s3 + $0x50] sm:$0xff] }
  0x19   : > { %227 = vst [vmem:[%s1603_s4 + $0x10] sm:$0xff] %v226_v2  ;;  %v234_v6 = vld [vmem:[%s1598_s3 + $0x60] sm:$0xff]  ;;  %v236_v7 = vld [vmem:[%s1598_s3 + $0x70] sm:$0xff] }
  0x1a   : > { %229 = vst [vmem:[%s1603_s4 + $0x18] sm:$0xff] %v228_v3  ;;  %v238_v8 = vld [vmem:[%s1598_s3 + $0x80] sm:$0xff]  ;;  %v240_v9 = vld [vmem:[%s1598_s3 + $0x90] sm:$0xff] }
  0x1b   : > { %231 = vst [vmem:[%s1603_s4 + $0x20] sm:$0xff] %v230_v4  ;;  %v242_v10 = vld [vmem:[%s1598_s3 + $0xa0] sm:$0xff]  ;;  %v244_v11 = vld [vmem:[%s1598_s3 + $0xb0] sm:$0xff] }
  0x1c   : > { %233 = vst [vmem:[%s1603_s4 + $0x28] sm:$0xff] %v232_v5  ;;  %v246_v12 = vld [vmem:[%s1598_s3 + $0xc0] sm:$0xff]  ;;  %v248_v13 = vld [vmem:[%s1598_s3 + $0xd0] sm:$0xff] }
  0x1d   : > { %235 = vst [vmem:[%s1603_s4 + $0x30] sm:$0xff] %v234_v6  ;;  %v250_v14 = vld [vmem:[%s1598_s3 + $0xe0] sm:$0xff]  ;;  %v252_v15 = vld [vmem:[%s1598_s3 + $0xf0] sm:$0xff] }
  0x1e   : > { %237 = vst [vmem:[%s1603_s4 + $0x38] sm:$0xff] %v236_v7  ;;  %v254_v16 = vld [vmem:[%s1598_s3 + $0x100] sm:$0xff]  ;;  %v256_v17 = vld [vmem:[%s1598_s3 + $0x110] sm:$0xff] }
  0x1f   : > { %239 = vst [vmem:[%s1603_s4 + $0x40] sm:$0xff] %v238_v8  ;;  %v258_v18 = vld [vmem:[%s1598_s3 + $0x120] sm:$0xff]  ;;  %v260_v19 = vld [vmem:[%s1598_s3 + $0x130] sm:$0xff] }
  0x20   : > { %241 = vst [vmem:[%s1603_s4 + $0x48] sm:$0xff] %v240_v9  ;;  %v262_v20 = vld [vmem:[%s1598_s3 + $0x140] sm:$0xff]  ;;  %v264_v21 = vld [vmem:[%s1598_s3 + $0x150] sm:$0xff] }
  0x21   : > { %243 = vst [vmem:[%s1603_s4 + $0x50] sm:$0xff] %v242_v10  ;;  %v266_v22 = vld [vmem:[%s1598_s3 + $0x160] sm:$0xff]  ;;  %v268_v23 = vld [vmem:[%s1598_s3 + $0x170] sm:$0xff] }
  0x22   : > { %245 = vst [vmem:[%s1603_s4 + $0x58] sm:$0xff] %v244_v11  ;;  %v270_v24 = vld [vmem:[%s1598_s3 + $0x180] sm:$0xff]  ;;  %v272_v25 = vld [vmem:[%s1598_s3 + $0x190] sm:$0xff] }
  0x23   : > { %247 = vst [vmem:[%s1603_s4 + $0x60] sm:$0xff] %v246_v12  ;;  %v274_v26 = vld [vmem:[%s1598_s3 + $0x1a0] sm:$0xff]  ;;  %v276_v27 = vld [vmem:[%s1598_s3 + $0x1b0] sm:$0xff] }
  0x24   : > { %249 = vst [vmem:[%s1603_s4 + $0x68] sm:$0xff] %v248_v13  ;;  %v278_v28 = vld [vmem:[%s1598_s3 + $0x1c0] sm:$0xff]  ;;  %v280_v29 = vld [vmem:[%s1598_s3 + $0x1d0] sm:$0xff] }
  0x25   : > { %251 = vst [vmem:[%s1603_s4 + $0x70] sm:$0xff] %v250_v14  ;;  %v282_v30 = vld [vmem:[%s1598_s3 + $0x1e0] sm:$0xff]  ;;  %v284_v31 = vld [vmem:[%s1598_s3 + $0x1f0] sm:$0xff] }
  0x26   : > { %253 = vst [vmem:[%s1603_s4 + $0x78] sm:$0xff] %v252_v15 }
  0x27   : > { %255 = vst [vmem:[%s1603_s4 + $0x80] sm:$0xff] %v254_v16 }
  0x28   : > { %257 = vst [vmem:[%s1603_s4 + $0x88] sm:$0xff] %v256_v17 }
  0x29   : > { %259 = vst [vmem:[%s1603_s4 + $0x90] sm:$0xff] %v258_v18 }
  0x2a   : > { %261 = vst [vmem:[%s1603_s4 + $0x98] sm:$0xff] %v260_v19 }
  0x2b   : > { %263 = vst [vmem:[%s1603_s4 + $0xa0] sm:$0xff] %v262_v20 }
  0x2c   : > { %265 = vst [vmem:[%s1603_s4 + $0xa8] sm:$0xff] %v264_v21 }
  0x2d   : > { %267 = vst [vmem:[%s1603_s4 + $0xb0] sm:$0xff] %v266_v22 }
  0x2e   : > { %269 = vst [vmem:[%s1603_s4 + $0xb8] sm:$0xff] %v268_v23 }
  0x2f   : > { %271 = vst [vmem:[%s1603_s4 + $0xc0] sm:$0xff] %v270_v24 }
  0x30   : > { %273 = vst [vmem:[%s1603_s4 + $0xc8] sm:$0xff] %v272_v25 }
  0x31   : > { %275 = vst [vmem:[%s1603_s4 + $0xd0] sm:$0xff] %v274_v26 }
  0x32   : > { %277 = vst [vmem:[%s1603_s4 + $0xd8] sm:$0xff] %v276_v27 }
  0x33   : > { %279 = vst [vmem:[%s1603_s4 + $0xe0] sm:$0xff] %v278_v28 }
  0x34   : > { %281 = vst [vmem:[%s1603_s4 + $0xe8] sm:$0xff] %v280_v29 }
  0x35   : > { %283 = vst [vmem:[%s1603_s4 + $0xf0] sm:$0xff] %v282_v30 }
  0x36   : > { %285 = vst [vmem:[%s1603_s4 + $0xf8] sm:$0xff] %v284_v31 }
  0x37 PF: > { %p1142_p7 = scmp.ge.s32.totalorder %s1520_s15, 1  ;;  %p299_p8 = scmp.lt.s32.totalorder %s1520_s15, 5 }
  0x39   : > { %p300_p9 = pnand %p1142_p7, %p299_p8 }
  0x3a   : > { %s306_s5 = sand.u32 (!%p300_p9), 1, %s1496_s9   ;;  %s1144_s6 = sshll.u32 (!%p300_p9), %s1504_s11, 5 }
  0x3b   : > { %303 = sbr.rel (%p300_p9) target bundleno = 428 (0x1ac), region = 62  ;;  %s1143_s7 = sshll.u32 (!%p300_p9), %s306_s5, 8 }
  0x3c   : > { %p335_p10 = scmp.lt.s32.totalorder (!%p300_p9), %s1144_s6, 63  ;;  %s1146_s8 = sshll.u32 (!%p300_p9), %s1508_s12, 5 }
  0x3d   : > { %p341_p11 = scmp.lt.s32.totalorder (!%p300_p9), %s1146_s8, 63  ;;  %s1681_s9 = scalar_lea.vmem (!%p300_p9), [#allocation3], %s1143_s7 }
  0x3e   : > { %p1148_p12 = scmp.ne.s32.totalorder (!%p300_p9), %s1504_s11, 0 }
  0x40   : > { %s1834_s6 = smov (!%p335_p10, %s1144_s6), 63  ;;  %s1836_s8 = smov (!%p341_p11, %s1146_s8), 63 }
  0x41   : > { %s1145_s18 = sshll.u32 %s1834_s6, 2  ;;  %s1147_s23 = sshll.u32 %s1836_s8, 3 }
  0x42   : > { %s1674_s21 = scalar_lea.vmem %s1819_s1, %s1145_s18  ;;  %s1679_s26 = scalar_lea.vmem %s1820_s2, %s1147_s23 }
  0x43   : > { %349 = sbr.rel (%p1148_p12) target bundleno = 105 (0x69), region = 70 }
  0x48   : > { %v1522_v32 = vmov 0.0  }
  0x49   : > { %350 = vst [vmem:[#allocation2 + $0xb0] sm:$0xff] %v1522_v32 }
  0x4a   : > { %351 = vst [vmem:[#allocation2] sm:$0xff] %v1522_v32 }
  0x4b   : > { %352 = vst [vmem:[#allocation2 + $0xd8] sm:$0xff] %v1522_v32 }
  0x4c   : > { %353 = vst [vmem:[#allocation2 + $0x18] sm:$0xff] %v1522_v32 }
  0x4d   : > { %354 = vst [vmem:[#allocation2 + $0x50] sm:$0xff] %v1522_v32 }
  0x4e   : > { %355 = vst [vmem:[#allocation2 + $0x68] sm:$0xff] %v1522_v32 }
  0x4f   : > { %356 = vst [vmem:[#allocation2 + $0x30] sm:$0xff] %v1522_v32 }
  0x50   : > { %357 = vst [vmem:[#allocation2 + $0x48] sm:$0xff] %v1522_v32 }
  0x51   : > { %358 = vst [vmem:[#allocation2 + $0x80] sm:$0xff] %v1522_v32 }
  0x52   : > { %359 = vst [vmem:[#allocation2 + $0x88] sm:$0xff] %v1522_v32 }
  0x53   : > { %360 = vst [vmem:[#allocation2 + $0xe8] sm:$0xff] %v1522_v32 }
  0x54   : > { %361 = vst [vmem:[#allocation2 + $0xb8] sm:$0xff] %v1522_v32 }
  0x55   : > { %362 = vst [vmem:[#allocation2 + $0x60] sm:$0xff] %v1522_v32 }
  0x56   : > { %363 = vst [vmem:[#allocation2 + $0xf0] sm:$0xff] %v1522_v32 }
  0x57   : > { %364 = vst [vmem:[#allocation2 + $0x8] sm:$0xff] %v1522_v32 }
  0x58   : > { %365 = vst [vmem:[#allocation2 + $0x78] sm:$0xff] %v1522_v32 }
  0x59   : > { %366 = vst [vmem:[#allocation2 + $0x38] sm:$0xff] %v1522_v32 }
  0x5a   : > { %367 = vst [vmem:[#allocation2 + $0x58] sm:$0xff] %v1522_v32 }
  0x5b   : > { %368 = vst [vmem:[#allocation2 + $0x40] sm:$0xff] %v1522_v32 }
  0x5c   : > { %369 = vst [vmem:[#allocation2 + $0xc8] sm:$0xff] %v1522_v32 }
  0x5d   : > { %370 = vst [vmem:[#allocation2 + $0xe0] sm:$0xff] %v1522_v32 }
  0x5e   : > { %371 = vst [vmem:[#allocation2 + $0x90] sm:$0xff] %v1522_v32 }
  0x5f   : > { %372 = vst [vmem:[#allocation2 + $0x70] sm:$0xff] %v1522_v32 }
  0x60   : > { %373 = vst [vmem:[#allocation2 + $0xc0] sm:$0xff] %v1522_v32 }
  0x61   : > { %374 = vst [vmem:[#allocation2 + $0xa8] sm:$0xff] %v1522_v32 }
  0x62   : > { %375 = vst [vmem:[#allocation2 + $0xd0] sm:$0xff] %v1522_v32 }
  0x63   : > { %376 = vst [vmem:[#allocation2 + $0x10] sm:$0xff] %v1522_v32 }
  0x64   : > { %377 = vst [vmem:[#allocation2 + $0x28] sm:$0xff] %v1522_v32 }
  0x65   : > { %378 = vst [vmem:[#allocation2 + $0xa0] sm:$0xff] %v1522_v32 }
  0x66   : > { %379 = vst [vmem:[#allocation2 + $0xf8] sm:$0xff] %v1522_v32 }
  0x67   : > { %380 = vst [vmem:[#allocation2 + $0x20] sm:$0xff] %v1522_v32 }
  0x68   : > { %381 = vst [vmem:[#allocation2 + $0x98] sm:$0xff] %v1522_v32 }
  0x69 PF: > { %v1384_v33 = vld [vmem:[%s1674_s21 + $0x38] sm:$0xff]  ;;  %v1383_v35 = vld [vmem:[%s1674_s21 + $0x30] sm:$0xff]  ;;  %v1382_v37 = vld [vmem:[%s1674_s21 + $0x28] sm:$0xff]  ;;  %p1341_p13 = scmp.ne.s32.totalorder %s1504_s11, 1 }
  0x6a   : > { %v1392_v34 = vld [vmem:[%s1674_s21 + $0x78] sm:$0xff]  ;;  %734 = vmatpush.bf16.msra.mxu0 %v1384_v33  ;;  %1393 = vmatpush.bf16.msra.mxu2 %v1384_v33  ;;  %v1391_v36 = vld [vmem:[%s1674_s21 + $0x70] sm:$0xff]  ;;  %v1390_v38 = vld [vmem:[%s1674_s21 + $0x68] sm:$0xff] }
  0x6b   : > { %823 = vmatpush.bf16.msra.mxu1 %v1392_v34  ;;  %1401 = vmatpush.bf16.msra.mxu3 %v1392_v34  ;;  %v1381_v39 = vld [vmem:[%s1674_s21 + $0x20] sm:$0xff]  ;;  %v1380_v41 = vld [vmem:[%s1674_s21 + $0x18] sm:$0xff]  ;;  %v1379_v43 = vld [vmem:[%s1674_s21 + $0x10] sm:$0xff] }
  0x6c   : > { %v1389_v40 = vld [vmem:[%s1674_s21 + $0x60] sm:$0xff]  ;;  %v1388_v42 = vld [vmem:[%s1674_s21 + $0x58] sm:$0xff]  ;;  %v1387_v44 = vld [vmem:[%s1674_s21 + $0x50] sm:$0xff] }
  0x6d   : > { %v1378_v45 = vld [vmem:[%s1674_s21 + $0x8] sm:$0xff]  ;;  %v1377_v47 = vld [vmem:[%s1674_s21] sm:$0xff]  ;;  %v1159_v61 = vld [vmem:[%s1681_s9 + $0x10] sm:$0xf] }
  0x6e   : > { %735 = vmatpush.bf16.msra.mxu0 %v1383_v35  ;;  %1394 = vmatpush.bf16.msra.mxu2 %v1383_v35  ;;  %v1386_v46 = vld [vmem:[%s1674_s21 + $0x48] sm:$0xff]  ;;  %v1385_v48 = vld [vmem:[%s1674_s21 + $0x40] sm:$0xff]  ;;  %v1348_v62 = vld [vmem:[%s1681_s9 + $0x14] sm:$0xf0] }
  0x6f   : > { %824 = vmatpush.bf16.msra.mxu1 %v1391_v36  ;;  %1402 = vmatpush.bf16.msra.mxu3 %v1391_v36  ;;  %v1151_v49 = vld [vmem:[%s1681_s9] sm:$0xf]  ;;  %v1346_v50 = vld [vmem:[%s1681_s9 + $0x4] sm:$0xf0]  ;;  %v1345_v53 = vld [vmem:[%s1681_s9 + $0x4] sm:$0xf]  ;;  %v1160_v5 = vor.u32 %v1348_v62, %v1159_v61 }
  0x70   : > { %v1215_v51 = vld [vmem:[%s1681_s9 + $0x80] sm:$0xf]  ;;  %v1362_v52 = vld [vmem:[%s1681_s9 + $0x84] sm:$0xf0]  ;;  %v1153_v54 = vld [vmem:[%s1681_s9 + $0x8] sm:$0xf0]  ;;  %v1152_v57 = vor.u32 %v1346_v50, %v1151_v49 }
  0x71   : > { %v1361_v55 = vld [vmem:[%s1681_s9 + $0x84] sm:$0xf]  ;;  %v1217_v56 = vld [vmem:[%s1681_s9 + $0x88] sm:$0xf0]  ;;  %v1216_v58 = vor.u32 %v1362_v52, %v1215_v51  ;;  %v1156_v59 = vor.u32 %v1345_v53, %v1153_v54  ;;  %v1223_v63 = vld [vmem:[%s1681_s9 + $0x90] sm:$0xf] }
  0x72   : > { %736 = vmatpush.bf16.msra.mxu0 %v1382_v37  ;;  %1395 = vmatpush.bf16.msra.mxu2 %v1382_v37  ;;  %v1220_v60 = vor.u32 %v1361_v55, %v1217_v56  ;;  %v1364_v0 = vld [vmem:[%s1681_s9 + $0x94] sm:$0xf0]  ;;  %v1347_v1 = vld [vmem:[%s1681_s9 + $0x14] sm:$0xf]  ;;  %v1161_v2 = vld [vmem:[%s1681_s9 + $0x18] sm:$0xf0] }
  0x73   : > { %825 = vmatpush.bf16.msra.mxu1 %v1390_v38  ;;  %1403 = vmatpush.bf16.msra.mxu3 %v1390_v38  ;;  %v1363_v3 = vld [vmem:[%s1681_s9 + $0x94] sm:$0xf]  ;;  %v1225_v4 = vld [vmem:[%s1681_s9 + $0x98] sm:$0xf0]  ;;  %v1224_v6 = vor.u32 %v1364_v0, %v1223_v63  ;;  %v1164_v7 = vor.u32 %v1347_v1, %v1161_v2  ;;  %v1167_v9 = vld [vmem:[%s1681_s9 + $0x20] sm:$0xf] }
  0x74   : > { %v1228_v8 = vor.u32 %v1363_v3, %v1225_v4  ;;  %v1350_v10 = vld [vmem:[%s1681_s9 + $0x24] sm:$0xf0]  ;;  %v1231_v11 = vld [vmem:[%s1681_s9 + $0xa0] sm:$0xf]  ;;  %v1349_v13 = vld [vmem:[%s1681_s9 + $0x24] sm:$0xf] }
  0x75   : > { %v1366_v12 = vld [vmem:[%s1681_s9 + $0xa4] sm:$0xf0]  ;;  %v1169_v14 = vld [vmem:[%s1681_s9 + $0x28] sm:$0xf0]  ;;  %v1365_v15 = vld [vmem:[%s1681_s9 + $0xa4] sm:$0xf]  ;;  %v1168_v17 = vor.u32 %v1350_v10, %v1167_v9 }
  0x76   : > { %737 = vmatpush.bf16.msra.mxu0 %v1381_v39  ;;  %1396 = vmatpush.bf16.msra.mxu2 %v1381_v39  ;;  %v1233_v16 = vld [vmem:[%s1681_s9 + $0xa8] sm:$0xf0]  ;;  %v1232_v18 = vor.u32 %v1366_v12, %v1231_v11  ;;  %v1172_v19 = vor.u32 %v1349_v13, %v1169_v14  ;;  %v1175_v21 = vld [vmem:[%s1681_s9 + $0x30] sm:$0xf]  ;;  %v1352_v22 = vld [vmem:[%s1681_s9 + $0x34] sm:$0xf0] }
  0x77   : > { %826 = vmatpush.bf16.msra.mxu1 %v1389_v40  ;;  %1404 = vmatpush.bf16.msra.mxu3 %v1389_v40  ;;  %v1236_v20 = vor.u32 %v1365_v15, %v1233_v16  ;;  %v1239_v23 = vld [vmem:[%s1681_s9 + $0xb0] sm:$0xf]  ;;  %v1368_v24 = vld [vmem:[%s1681_s9 + $0xb4] sm:$0xf0]  ;;  %v1351_v25 = vld [vmem:[%s1681_s9 + $0x34] sm:$0xf]  ;;  %v1176_v29 = vor.u32 %v1352_v22, %v1175_v21 }
  0x78   : > { %v1177_v26 = vld [vmem:[%s1681_s9 + $0x38] sm:$0xf0]  ;;  %v1367_v27 = vld [vmem:[%s1681_s9 + $0xb4] sm:$0xf]  ;;  %v1240_v30 = vor.u32 %v1368_v24, %v1239_v23  ;;  %v1183_v33 = vld [vmem:[%s1681_s9 + $0x40] sm:$0xf] }
  0x79   : > { %v1241_v28 = vld [vmem:[%s1681_s9 + $0xb8] sm:$0xf0]  ;;  %v1180_v31 = vor.u32 %v1351_v25, %v1177_v26  ;;  %v1354_v34 = vld [vmem:[%s1681_s9 + $0x44] sm:$0xf0]  ;;  %v1247_v35 = vld [vmem:[%s1681_s9 + $0xc0] sm:$0xf] }
  0x7a   : > { %738 = vmatpush.bf16.msra.mxu0 %v1380_v41  ;;  %1397 = vmatpush.bf16.msra.mxu2 %v1380_v41  ;;  %v1244_v32 = vor.u32 %v1367_v27, %v1241_v28  ;;  %v1370_v36 = vld [vmem:[%s1681_s9 + $0xc4] sm:$0xf0]  ;;  %v1353_v37 = vld [vmem:[%s1681_s9 + $0x44] sm:$0xf]  ;;  %v1185_v38 = vld [vmem:[%s1681_s9 + $0x48] sm:$0xf0]  ;;  %v1184_v41 = vor.u32 %v1354_v34, %v1183_v33 }
  0x7b   : > { %827 = vmatpush.bf16.msra.mxu1 %v1388_v42  ;;  %1405 = vmatpush.bf16.msra.mxu3 %v1388_v42  ;;  %v1369_v39 = vld [vmem:[%s1681_s9 + $0xc4] sm:$0xf]  ;;  %v1249_v40 = vld [vmem:[%s1681_s9 + $0xc8] sm:$0xf0]  ;;  %v1248_v42 = vor.u32 %v1370_v36, %v1247_v35  ;;  %v1355_v49 = vld [vmem:[%s1681_s9 + $0x54] sm:$0xf] }
  0x7c   : > { %v1193_v50 = vld [vmem:[%s1681_s9 + $0x58] sm:$0xf0]  ;;  %v1371_v51 = vld [vmem:[%s1681_s9 + $0xd4] sm:$0xf]  ;;  %v1357_v61 = vld [vmem:[%s1681_s9 + $0x64] sm:$0xf] }
  0x7d   : > { %v1257_v52 = vld [vmem:[%s1681_s9 + $0xd8] sm:$0xf0]  ;;  %v1196_v55 = vor.u32 %v1355_v49, %v1193_v50  ;;  %v1201_v62 = vld [vmem:[%s1681_s9 + $0x68] sm:$0xf0]  ;;  %v1373_v63 = vld [vmem:[%s1681_s9 + $0xe4] sm:$0xf] }
  0x7e   : > { %739 = vmatpush.bf16.msra.mxu0 %v1379_v43  ;;  %1398 = vmatpush.bf16.msra.mxu2 %v1379_v43  ;;  %v1188_v43 = vor.u32 %v1353_v37, %v1185_v38  ;;  %v1260_v56 = vor.u32 %v1371_v51, %v1257_v52  ;;  %v1265_v0 = vld [vmem:[%s1681_s9 + $0xe8] sm:$0xf0]  ;;  %v1204_v3 = vor.u32 %v1357_v61, %v1201_v62  ;;  %v1359_v9 = vld [vmem:[%s1681_s9 + $0x74] sm:$0xf]  ;;  %v1209_v10 = vld [vmem:[%s1681_s9 + $0x78] sm:$0xf0] }
  0x7f   : > { %828 = vmatpush.bf16.msra.mxu1 %v1387_v44  ;;  %1406 = vmatpush.bf16.msra.mxu3 %v1387_v44  ;;  %v1252_v44 = vor.u32 %v1369_v39, %v1249_v40  ;;  %v1268_v4 = vor.u32 %v1373_v63, %v1265_v0  ;;  %v1375_v11 = vld [vmem:[%s1681_s9 + $0xf4] sm:$0xf]  ;;  %v1273_v12 = vld [vmem:[%s1681_s9 + $0xf8] sm:$0xf0]  ;;  %v1212_v15 = vor.u32 %v1359_v9, %v1209_v10  ;;  %v383_v27 = vld [vmem:[#allocation2] sm:$0xff] }
  0x80   : > { %v1276_v16 = vor.u32 %v1375_v11, %v1273_v12  ;;  %v398_v23 = vld [vmem:[#allocation2 + $0x38] sm:$0xff]  ;;  %v402_v63 = vld [vmem:[#allocation2 + $0xe0] sm:$0xff]  ;;  %v403_v9 = vld [vmem:[#allocation2 + $0x90] sm:$0xff] }
  0x81   : > { %v399_v33 = vld [vmem:[#allocation2 + $0x58] sm:$0xff] }
  0x82   : > { %740 = vmatpush.bf16.msra.mxu0 %v1378_v45  ;;  %1399 = vmatpush.bf16.msra.mxu2 %v1378_v45  ;;  %v1191_v45 = vld [vmem:[%s1681_s9 + $0x50] sm:$0xf]  ;;  %v384_v37 = vld [vmem:[#allocation2 + $0xd8] sm:$0xff] }
  0x83   : > { %829 = vmatpush.bf16.msra.mxu1 %v1386_v46  ;;  %1407 = vmatpush.bf16.msra.mxu3 %v1386_v46  ;;  %v1356_v46 = vld [vmem:[%s1681_s9 + $0x54] sm:$0xf0] }
  0x84   : > { %v1192_v53 = vor.u32 %v1356_v46, %v1191_v45 }
  0x86   : > { %741 = vmatpush.bf16.msra.mxu0 %v1377_v47  ;;  %1400 = vmatpush.bf16.msra.mxu2 %v1377_v47  ;;  %v1255_v47 = vld [vmem:[%s1681_s9 + $0xd0] sm:$0xf] }
  0x87   : > { %830 = vmatpush.bf16.msra.mxu1 %v1385_v48  ;;  %1408 = vmatpush.bf16.msra.mxu3 %v1385_v48  ;;  %v1372_v48 = vld [vmem:[%s1681_s9 + $0xd4] sm:$0xf0] }
  0x88   : > { %v1256_v54 = vor.u32 %v1372_v48, %v1255_v47  ;;  %v385_v47 = vld [vmem:[#allocation2 + $0x18] sm:$0xff] }
  0x89   : > { %742 = vmatmul.bf16.vlgmr.msra.gmra.mxu0 %v1152_v57  ;;  %782 = vmatmul.bf16.vlgmr.msra.gmra.mxu2 %v1216_v58  ;;  %v1199_v57 = vld [vmem:[%s1681_s9 + $0x60] sm:$0xf]  ;;  %v1358_v58 = vld [vmem:[%s1681_s9 + $0x64] sm:$0xf0] }
  0x8a   : > { %831 = vmatmul.bf16.vlgmr.msra.gmra.mxu1 %v1156_v59  ;;  %871 = vmatmul.bf16.vlgmr.msra.gmra.mxu3 %v1220_v60  ;;  %v1263_v59 = vld [vmem:[%s1681_s9 + $0xe0] sm:$0xf]  ;;  %v1374_v60 = vld [vmem:[%s1681_s9 + $0xe4] sm:$0xf0]  ;;  %v1200_v1 = vor.u32 %v1358_v58, %v1199_v57  ;;  %v386_v57 = vld [vmem:[#allocation2 + $0x50] sm:$0xff] }
  0x8b   : > { %v1264_v2 = vor.u32 %v1374_v60, %v1263_v59 }
  0x99   : > { %747 = vmatmul.bf16.gmra.mxu0 %v1160_v5  ;;  %787 = vmatmul.bf16.gmra.mxu2 %v1224_v6  ;;  %v1207_v5 = vld [vmem:[%s1681_s9 + $0x70] sm:$0xf]  ;;  %v1360_v6 = vld [vmem:[%s1681_s9 + $0x74] sm:$0xf0] }
  0x9a   : > { %836 = vmatmul.bf16.gmra.mxu1 %v1164_v7  ;;  %876 = vmatmul.bf16.gmra.mxu3 %v1228_v8  ;;  %v1271_v7 = vld [vmem:[%s1681_s9 + $0xf0] sm:$0xf]  ;;  %v1376_v8 = vld [vmem:[%s1681_s9 + $0xf4] sm:$0xf0]  ;;  %v1208_v13 = vor.u32 %v1360_v6, %v1207_v5 }
  0x9b   : > { %v1272_v14 = vor.u32 %v1376_v8, %v1271_v7 }
  0xa9   : > { %752 = vmatmul.bf16.gmra.mxu0 %v1168_v17  ;;  %792 = vmatmul.bf16.gmra.mxu2 %v1232_v18  ;;  %v382_v18 = vld [vmem:[#allocation2 + $0xb0] sm:$0xff] }
  0xaa   : > { %841 = vmatmul.bf16.gmra.mxu1 %v1172_v19  ;;  %881 = vmatmul.bf16.gmra.mxu3 %v1236_v20 }
  0xb9   : > { %757 = vmatmul.bf16.gmra.mxu0 %v1176_v29  ;;  %797 = vmatmul.bf16.gmra.mxu2 %v1240_v30 }
  0xba   : > { %846 = vmatmul.bf16.gmra.mxu1 %v1180_v31  ;;  %886 = vmatmul.bf16.gmra.mxu3 %v1244_v32 }
  0xc9   : > { %762 = vmatmul.bf16.gmra.mxu0 %v1184_v41  ;;  %802 = vmatmul.bf16.gmra.mxu2 %v1248_v42 }
  0xca   : > { %851 = vmatmul.bf16.gmra.mxu1 %v1188_v43  ;;  %891 = vmatmul.bf16.gmra.mxu3 %v1252_v44  ;;  %v400_v43 = vld [vmem:[#allocation2 + $0x40] sm:$0xff] }
  0xd9   : > { %767 = vmatmul.bf16.gmra.mxu0 %v1192_v53  ;;  %807 = vmatmul.bf16.gmra.mxu2 %v1256_v54  ;;  %v401_v53 = vld [vmem:[#allocation2 + $0xc8] sm:$0xff] }
  0xda   : > { %856 = vmatmul.bf16.gmra.mxu1 %v1196_v55  ;;  %896 = vmatmul.bf16.gmra.mxu3 %v1260_v56 }
  0xe9   : > { %772 = vmatmul.bf16.gmra.mxu0 %v1200_v1  ;;  %812 = vmatmul.bf16.gmra.mxu2 %v1264_v2 }
  0xea   : > { %861 = vmatmul.bf16.gmra.mxu1 %v1204_v3  ;;  %901 = vmatmul.bf16.gmra.mxu3 %v1268_v4  ;;  %v387_v3 = vld [vmem:[#allocation2 + $0x68] sm:$0xff] }
  0xf9   : > { %777 = vmatmul.bf16.gmra.mxu0 %v1208_v13  ;;  %817 = vmatmul.bf16.gmra.mxu2 %v1272_v14  ;;  %v388_v13 = vld [vmem:[#allocation2 + $0x30] sm:$0xff] }
  0xfa   : > { %866 = vmatmul.bf16.gmra.mxu1 %v1212_v15  ;;  %906 = vmatmul.bf16.gmra.mxu3 %v1276_v16 }
 0x106   : > { %v743_v17 = vpop.f32.mrf.mxu0 }
 0x107   : > { %v832_v19 = vpop.f32.mrf.mxu1 }
 0x108   : > { %v833_v20 = vadd.f32 %v832_v19, %v743_v17  ;;  %v404_v19 = vld [vmem:[#allocation2 + $0x70] sm:$0xff] }
 0x10a   : > { %v912_v21 = vadd.f32 %v833_v20, %v382_v18 }
 0x10c   : > { %944 = vst [vmem:[#allocation2 + $0xb0] sm:$0xff] %v912_v21  ;;  %v783_v22 = vpop.f32.mrf.mxu2 }
 0x10d   : > { %v872_v24 = vpop.f32.mrf.mxu3 }
 0x10e   : > { %v873_v25 = vadd.f32 %v872_v24, %v783_v22  ;;  %v745_v26 = vpop.f32.mrf.mxu0 }
 0x10f   : > { %v834_v28 = vpop.f32.mrf.mxu1 }
 0x110   : > { %v928_v29 = vadd.f32 %v873_v25, %v398_v23  ;;  %v835_v30 = vadd.f32 %v834_v28, %v745_v26  ;;  %v389_v23 = vld [vmem:[#allocation2 + $0x48] sm:$0xff] }
 0x112   : > { %960 = vst [vmem:[#allocation2 + $0x38] sm:$0xff] %v928_v29  ;;  %v913_v31 = vadd.f32 %v835_v30, %v383_v27  ;;  %v405_v29 = vld [vmem:[#allocation2 + $0xc0] sm:$0xff] }
 0x114   : > { %945 = vst [vmem:[#allocation2] sm:$0xff] %v913_v31  ;;  %v785_v32 = vpop.f32.mrf.mxu2 }
 0x115   : > { %v874_v34 = vpop.f32.mrf.mxu3 }
 0x116   : > { %v875_v35 = vadd.f32 %v874_v34, %v785_v32  ;;  %v748_v36 = vpop.f32.mrf.mxu0 }
 0x117   : > { %v837_v38 = vpop.f32.mrf.mxu1 }
 0x118   : > { %v929_v39 = vadd.f32 %v875_v35, %v399_v33  ;;  %v838_v40 = vadd.f32 %v837_v38, %v748_v36  ;;  %v390_v33 = vld [vmem:[#allocation2 + $0x80] sm:$0xff] }
 0x11a   : > { %961 = vst [vmem:[#allocation2 + $0x58] sm:$0xff] %v929_v39  ;;  %v914_v41 = vadd.f32 %v838_v40, %v384_v37  ;;  %v406_v39 = vld [vmem:[#allocation2 + $0xa8] sm:$0xff] }
 0x11c   : > { %946 = vst [vmem:[#allocation2 + $0xd8] sm:$0xff] %v914_v41  ;;  %v788_v42 = vpop.f32.mrf.mxu2 }
 0x11d   : > { %v877_v44 = vpop.f32.mrf.mxu3 }
 0x11e   : > { %v878_v45 = vadd.f32 %v877_v44, %v788_v42  ;;  %v750_v46 = vpop.f32.mrf.mxu0 }
 0x11f   : > { %v839_v48 = vpop.f32.mrf.mxu1 }
 0x120   : > { %v930_v49 = vadd.f32 %v878_v45, %v400_v43  ;;  %v840_v50 = vadd.f32 %v839_v48, %v750_v46  ;;  %v391_v43 = vld [vmem:[#allocation2 + $0x88] sm:$0xff] }
 0x122   : > { %962 = vst [vmem:[#allocation2 + $0x40] sm:$0xff] %v930_v49  ;;  %v915_v51 = vadd.f32 %v840_v50, %v385_v47  ;;  %v407_v49 = vld [vmem:[#allocation2 + $0xd0] sm:$0xff] }
 0x124   : > { %947 = vst [vmem:[#allocation2 + $0x18] sm:$0xff] %v915_v51  ;;  %v790_v52 = vpop.f32.mrf.mxu2 }
 0x125   : > { %v879_v54 = vpop.f32.mrf.mxu3 }
 0x126   : > { %v880_v55 = vadd.f32 %v879_v54, %v790_v52  ;;  %v753_v56 = vpop.f32.mrf.mxu0 }
 0x127   : > { %v842_v58 = vpop.f32.mrf.mxu1 }
 0x128   : > { %v931_v59 = vadd.f32 %v880_v55, %v401_v53  ;;  %v843_v60 = vadd.f32 %v842_v58, %v753_v56  ;;  %v392_v53 = vld [vmem:[#allocation2 + $0xe8] sm:$0xff] }
 0x12a   : > { %963 = vst [vmem:[#allocation2 + $0xc8] sm:$0xff] %v931_v59  ;;  %v916_v61 = vadd.f32 %v843_v60, %v386_v57  ;;  %v408_v59 = vld [vmem:[#allocation2 + $0x10] sm:$0xff] }
 0x12c   : > { %948 = vst [vmem:[#allocation2 + $0x50] sm:$0xff] %v916_v61  ;;  %v793_v62 = vpop.f32.mrf.mxu2 }
 0x12d   : > { %v882_v0 = vpop.f32.mrf.mxu3 }
 0x12e   : > { %v883_v1 = vadd.f32 %v882_v0, %v793_v62  ;;  %v755_v2 = vpop.f32.mrf.mxu0 }
 0x12f   : > { %v844_v4 = vpop.f32.mrf.mxu1 }
 0x130   : > { %v932_v5 = vadd.f32 %v883_v1, %v402_v63  ;;  %v845_v6 = vadd.f32 %v844_v4, %v755_v2  ;;  %v393_v63 = vld [vmem:[#allocation2 + $0xb8] sm:$0xff] }
 0x132   : > { %964 = vst [vmem:[#allocation2 + $0xe0] sm:$0xff] %v932_v5  ;;  %v917_v7 = vadd.f32 %v845_v6, %v387_v3  ;;  %v409_v5 = vld [vmem:[#allocation2 + $0x28] sm:$0xff] }
 0x134   : > { %949 = vst [vmem:[#allocation2 + $0x68] sm:$0xff] %v917_v7  ;;  %v795_v8 = vpop.f32.mrf.mxu2 }
 0x135   : > { %v884_v10 = vpop.f32.mrf.mxu3 }
 0x136   : > { %v885_v11 = vadd.f32 %v884_v10, %v795_v8  ;;  %v758_v12 = vpop.f32.mrf.mxu0 }
 0x137   : > { %v847_v14 = vpop.f32.mrf.mxu1 }
 0x138   : > { %v933_v15 = vadd.f32 %v885_v11, %v403_v9  ;;  %v848_v16 = vadd.f32 %v847_v14, %v758_v12  ;;  %v394_v9 = vld [vmem:[#allocation2 + $0x60] sm:$0xff] }
 0x13a   : > { %965 = vst [vmem:[#allocation2 + $0x90] sm:$0xff] %v933_v15  ;;  %v918_v17 = vadd.f32 %v848_v16, %v388_v13  ;;  %v410_v15 = vld [vmem:[#allocation2 + $0xa0] sm:$0xff] }
 0x13c   : > { %950 = vst [vmem:[#allocation2 + $0x30] sm:$0xff] %v918_v17  ;;  %v798_v18 = vpop.f32.mrf.mxu2 }
 0x13d   : > { %v887_v20 = vpop.f32.mrf.mxu3 }
 0x13e   : > { %v888_v21 = vadd.f32 %v887_v20, %v798_v18  ;;  %v760_v22 = vpop.f32.mrf.mxu0 }
 0x13f   : > { %v849_v24 = vpop.f32.mrf.mxu1 }
 0x140   : > { %v934_v25 = vadd.f32 %v888_v21, %v404_v19  ;;  %v850_v26 = vadd.f32 %v849_v24, %v760_v22  ;;  %v395_v19 = vld [vmem:[#allocation2 + $0xf0] sm:$0xff] }
 0x142   : > { %966 = vst [vmem:[#allocation2 + $0x70] sm:$0xff] %v934_v25  ;;  %v919_v27 = vadd.f32 %v850_v26, %v389_v23  ;;  %v411_v25 = vld [vmem:[#allocation2 + $0xf8] sm:$0xff] }
 0x144   : > { %951 = vst [vmem:[#allocation2 + $0x48] sm:$0xff] %v919_v27  ;;  %v800_v28 = vpop.f32.mrf.mxu2 }
 0x145   : > { %v889_v30 = vpop.f32.mrf.mxu3 }
 0x146   : > { %v890_v31 = vadd.f32 %v889_v30, %v800_v28  ;;  %v763_v32 = vpop.f32.mrf.mxu0 }
 0x147   : > { %v852_v34 = vpop.f32.mrf.mxu1 }
 0x148   : > { %v935_v35 = vadd.f32 %v890_v31, %v405_v29  ;;  %v853_v36 = vadd.f32 %v852_v34, %v763_v32  ;;  %v396_v29 = vld [vmem:[#allocation2 + $0x8] sm:$0xff] }
 0x14a   : > { %967 = vst [vmem:[#allocation2 + $0xc0] sm:$0xff] %v935_v35  ;;  %v920_v37 = vadd.f32 %v853_v36, %v390_v33  ;;  %v412_v35 = vld [vmem:[#allocation2 + $0x20] sm:$0xff] }
 0x14c   : > { %952 = vst [vmem:[#allocation2 + $0x80] sm:$0xff] %v920_v37  ;;  %v803_v38 = vpop.f32.mrf.mxu2 }
 0x14d   : > { %v892_v40 = vpop.f32.mrf.mxu3 }
 0x14e   : > { %v893_v41 = vadd.f32 %v892_v40, %v803_v38  ;;  %v765_v42 = vpop.f32.mrf.mxu0 }
 0x14f   : > { %v854_v44 = vpop.f32.mrf.mxu1 }
 0x150   : > { %v936_v45 = vadd.f32 %v893_v41, %v406_v39  ;;  %v855_v46 = vadd.f32 %v854_v44, %v765_v42  ;;  %v397_v39 = vld [vmem:[#allocation2 + $0x78] sm:$0xff] }
 0x152   : > { %968 = vst [vmem:[#allocation2 + $0xa8] sm:$0xff] %v936_v45  ;;  %v921_v47 = vadd.f32 %v855_v46, %v391_v43  ;;  %v413_v45 = vld [vmem:[#allocation2 + $0x98] sm:$0xff] }
 0x154   : > { %953 = vst [vmem:[#allocation2 + $0x88] sm:$0xff] %v921_v47  ;;  %v805_v48 = vpop.f32.mrf.mxu2 }
 0x155   : > { %v894_v50 = vpop.f32.mrf.mxu3 }
 0x156   : > { %v895_v51 = vadd.f32 %v894_v50, %v805_v48  ;;  %v768_v52 = vpop.f32.mrf.mxu0 }
 0x157   : > { %v857_v54 = vpop.f32.mrf.mxu1 }
 0x158   : > { %v937_v55 = vadd.f32 %v895_v51, %v407_v49  ;;  %v858_v56 = vadd.f32 %v857_v54, %v768_v52 }
 0x15a   : > { %969 = vst [vmem:[#allocation2 + $0xd0] sm:$0xff] %v937_v55  ;;  %v922_v57 = vadd.f32 %v858_v56, %v392_v53 }
 0x15c   : > { %954 = vst [vmem:[#allocation2 + $0xe8] sm:$0xff] %v922_v57  ;;  %v808_v58 = vpop.f32.mrf.mxu2 }
 0x15d   : > { %v897_v60 = vpop.f32.mrf.mxu3 }
 0x15e   : > { %v898_v61 = vadd.f32 %v897_v60, %v808_v58  ;;  %v770_v62 = vpop.f32.mrf.mxu0 }
 0x15f   : > { %v859_v0 = vpop.f32.mrf.mxu1 }
 0x160   : > { %v938_v1 = vadd.f32 %v898_v61, %v408_v59  ;;  %v860_v2 = vadd.f32 %v859_v0, %v770_v62 }
 0x162   : > { %970 = vst [vmem:[#allocation2 + $0x10] sm:$0xff] %v938_v1  ;;  %v923_v3 = vadd.f32 %v860_v2, %v393_v63 }
 0x164   : > { %955 = vst [vmem:[#allocation2 + $0xb8] sm:$0xff] %v923_v3  ;;  %v810_v4 = vpop.f32.mrf.mxu2 }
 0x165   : > { %v899_v6 = vpop.f32.mrf.mxu3 }
 0x166   : > { %v900_v7 = vadd.f32 %v899_v6, %v810_v4  ;;  %v773_v8 = vpop.f32.mrf.mxu0 }
 0x167   : > { %v862_v10 = vpop.f32.mrf.mxu1 }
 0x168   : > { %v939_v11 = vadd.f32 %v900_v7, %v409_v5  ;;  %v863_v12 = vadd.f32 %v862_v10, %v773_v8 }
 0x16a   : > { %971 = vst [vmem:[#allocation2 + $0x28] sm:$0xff] %v939_v11  ;;  %v924_v13 = vadd.f32 %v863_v12, %v394_v9 }
 0x16c   : > { %956 = vst [vmem:[#allocation2 + $0x60] sm:$0xff] %v924_v13  ;;  %v813_v14 = vpop.f32.mrf.mxu2 }
 0x16d   : > { %v902_v16 = vpop.f32.mrf.mxu3 }
 0x16e   : > { %v903_v17 = vadd.f32 %v902_v16, %v813_v14  ;;  %v775_v18 = vpop.f32.mrf.mxu0 }
 0x16f   : > { %v864_v20 = vpop.f32.mrf.mxu1 }
 0x170   : > { %v940_v21 = vadd.f32 %v903_v17, %v410_v15  ;;  %v865_v22 = vadd.f32 %v864_v20, %v775_v18 }
 0x172   : > { %972 = vst [vmem:[#allocation2 + $0xa0] sm:$0xff] %v940_v21  ;;  %v925_v23 = vadd.f32 %v865_v22, %v395_v19 }
 0x174   : > { %957 = vst [vmem:[#allocation2 + $0xf0] sm:$0xff] %v925_v23  ;;  %v815_v24 = vpop.f32.mrf.mxu2 }
 0x175   : > { %v904_v26 = vpop.f32.mrf.mxu3 }
 0x176   : > { %v905_v27 = vadd.f32 %v904_v26, %v815_v24  ;;  %v778_v28 = vpop.f32.mrf.mxu0 }
 0x177   : > { %v867_v30 = vpop.f32.mrf.mxu1 }
 0x178   : > { %v941_v31 = vadd.f32 %v905_v27, %v411_v25  ;;  %v868_v32 = vadd.f32 %v867_v30, %v778_v28 }
 0x17a   : > { %973 = vst [vmem:[#allocation2 + $0xf8] sm:$0xff] %v941_v31  ;;  %v926_v33 = vadd.f32 %v868_v32, %v396_v29 }
 0x17c   : > { %958 = vst [vmem:[#allocation2 + $0x8] sm:$0xff] %v926_v33  ;;  %v818_v34 = vpop.f32.mrf.mxu2 }
 0x17d   : > { %v907_v36 = vpop.f32.mrf.mxu3 }
 0x17e   : > { %v908_v37 = vadd.f32 %v907_v36, %v818_v34  ;;  %v780_v38 = vpop.f32.mrf.mxu0 }
 0x17f   : > { %v869_v40 = vpop.f32.mrf.mxu1 }
 0x180   : > { %v942_v41 = vadd.f32 %v908_v37, %v412_v35  ;;  %v870_v42 = vadd.f32 %v869_v40, %v780_v38 }
 0x182   : > { %974 = vst [vmem:[#allocation2 + $0x20] sm:$0xff] %v942_v41  ;;  %v927_v43 = vadd.f32 %v870_v42, %v397_v39 }
 0x184   : > { %959 = vst [vmem:[#allocation2 + $0x78] sm:$0xff] %v927_v43  ;;  %v820_v44 = vpop.f32.mrf.mxu2 }
 0x185   : > { %v909_v46 = vpop.f32.mrf.mxu3 }
 0x186   : > { %v910_v47 = vadd.f32 %v909_v46, %v820_v44  ;;  %979 = sbr.rel (%p1341_p13) target bundleno = 428 (0x1ac), region = 74 }
 0x188   : > { %v943_v48 = vadd.f32 %v910_v47, %v413_v45 }
 0x18a   : > { %975 = vst [vmem:[#allocation2 + $0x98] sm:$0xff] %v943_v48 }
 0x18b   : > { %v980_v49 = vld [vmem:[#allocation2 + $0xb0] sm:$0xff]  ;;  %v981_v50 = vld [vmem:[#allocation2] sm:$0xff]  ;;  %v982_v51 = vld [vmem:[#allocation2 + $0xd8] sm:$0xff] }
 0x18c   : > { %1012 = vst [vmem:[%s1679_s26] sm:$0xff] %v980_v49  ;;  %v983_v52 = vld [vmem:[#allocation2 + $0x18] sm:$0xff]  ;;  %v984_v53 = vld [vmem:[#allocation2 + $0x50] sm:$0xff]  ;;  %v985_v54 = vld [vmem:[#allocation2 + $0x68] sm:$0xff] }
 0x18d   : > { %1013 = vst [vmem:[%s1679_s26 + $0x8] sm:$0xff] %v981_v50  ;;  %v986_v55 = vld [vmem:[#allocation2 + $0x30] sm:$0xff]  ;;  %v987_v56 = vld [vmem:[#allocation2 + $0x48] sm:$0xff]  ;;  %v988_v57 = vld [vmem:[#allocation2 + $0x80] sm:$0xff] }
 0x18e   : > { %1014 = vst [vmem:[%s1679_s26 + $0x10] sm:$0xff] %v982_v51  ;;  %v989_v58 = vld [vmem:[#allocation2 + $0x88] sm:$0xff]  ;;  %v991_v60 = vld [vmem:[#allocation2 + $0xb8] sm:$0xff]  ;;  %v992_v61 = vld [vmem:[#allocation2 + $0x60] sm:$0xff] }
 0x18f   : > { %1015 = vst [vmem:[%s1679_s26 + $0x18] sm:$0xff] %v983_v52  ;;  %v990_v59 = vld [vmem:[#allocation2 + $0xe8] sm:$0xff]  ;;  %v993_v62 = vld [vmem:[#allocation2 + $0xf0] sm:$0xff]  ;;  %v995_v0 = vld [vmem:[#allocation2 + $0x78] sm:$0xff] }
 0x190   : > { %1016 = vst [vmem:[%s1679_s26 + $0x20] sm:$0xff] %v984_v53  ;;  %v994_v63 = vld [vmem:[#allocation2 + $0x8] sm:$0xff]  ;;  %v996_v1 = vld [vmem:[#allocation2 + $0x38] sm:$0xff]  ;;  %v998_v3 = vld [vmem:[#allocation2 + $0x40] sm:$0xff] }
 0x191   : > { %1017 = vst [vmem:[%s1679_s26 + $0x28] sm:$0xff] %v985_v54  ;;  %v997_v2 = vld [vmem:[#allocation2 + $0x58] sm:$0xff]  ;;  %v999_v4 = vld [vmem:[#allocation2 + $0xc8] sm:$0xff]  ;;  %v1000_v5 = vld [vmem:[#allocation2 + $0xe0] sm:$0xff] }
 0x192   : > { %1018 = vst [vmem:[%s1679_s26 + $0x30] sm:$0xff] %v986_v55  ;;  %v1001_v6 = vld [vmem:[#allocation2 + $0x90] sm:$0xff]  ;;  %v1003_v8 = vld [vmem:[#allocation2 + $0xc0] sm:$0xff]  ;;  %v1004_v9 = vld [vmem:[#allocation2 + $0xa8] sm:$0xff] }
 0x193   : > { %1019 = vst [vmem:[%s1679_s26 + $0x38] sm:$0xff] %v987_v56  ;;  %v1002_v7 = vld [vmem:[#allocation2 + $0x70] sm:$0xff]  ;;  %v1007_v12 = vld [vmem:[#allocation2 + $0x28] sm:$0xff]  ;;  %v1008_v13 = vld [vmem:[#allocation2 + $0xa0] sm:$0xff] }
 0x194   : > { %1020 = vst [vmem:[%s1679_s26 + $0x40] sm:$0xff] %v988_v57  ;;  %v1005_v10 = vld [vmem:[#allocation2 + $0xd0] sm:$0xff]  ;;  %v1009_v14 = vld [vmem:[#allocation2 + $0xf8] sm:$0xff]  ;;  %v1010_v15 = vld [vmem:[#allocation2 + $0x20] sm:$0xff] }
 0x195   : > { %1021 = vst [vmem:[%s1679_s26 + $0x48] sm:$0xff] %v989_v58  ;;  %v1006_v11 = vld [vmem:[#allocation2 + $0x10] sm:$0xff]  ;;  %v1011_v16 = vld [vmem:[#allocation2 + $0x98] sm:$0xff] }
 0x196   : > { %1022 = vst [vmem:[%s1679_s26 + $0x50] sm:$0xff] %v990_v59 }
 0x197   : > { %1023 = vst [vmem:[%s1679_s26 + $0x58] sm:$0xff] %v991_v60 }
 0x198   : > { %1024 = vst [vmem:[%s1679_s26 + $0x60] sm:$0xff] %v992_v61 }
 0x199   : > { %1025 = vst [vmem:[%s1679_s26 + $0x68] sm:$0xff] %v993_v62 }
 0x19a   : > { %1026 = vst [vmem:[%s1679_s26 + $0x70] sm:$0xff] %v994_v63 }
 0x19b   : > { %1027 = vst [vmem:[%s1679_s26 + $0x78] sm:$0xff] %v995_v0 }
 0x19c   : > { %1028 = vst [vmem:[%s1679_s26 + $0x80] sm:$0xff] %v996_v1 }
 0x19d   : > { %1029 = vst [vmem:[%s1679_s26 + $0x88] sm:$0xff] %v997_v2 }
 0x19e   : > { %1030 = vst [vmem:[%s1679_s26 + $0x90] sm:$0xff] %v998_v3 }
 0x19f   : > { %1031 = vst [vmem:[%s1679_s26 + $0x98] sm:$0xff] %v999_v4 }
 0x1a0   : > { %1032 = vst [vmem:[%s1679_s26 + $0xa0] sm:$0xff] %v1000_v5 }
 0x1a1   : > { %1033 = vst [vmem:[%s1679_s26 + $0xa8] sm:$0xff] %v1001_v6 }
 0x1a2   : > { %1034 = vst [vmem:[%s1679_s26 + $0xb0] sm:$0xff] %v1002_v7 }
 0x1a3   : > { %1035 = vst [vmem:[%s1679_s26 + $0xb8] sm:$0xff] %v1003_v8 }
 0x1a4   : > { %1036 = vst [vmem:[%s1679_s26 + $0xc0] sm:$0xff] %v1004_v9 }
 0x1a5   : > { %1037 = vst [vmem:[%s1679_s26 + $0xc8] sm:$0xff] %v1005_v10 }
 0x1a6   : > { %1038 = vst [vmem:[%s1679_s26 + $0xd0] sm:$0xff] %v1006_v11 }
 0x1a7   : > { %1039 = vst [vmem:[%s1679_s26 + $0xd8] sm:$0xff] %v1007_v12 }
 0x1a8   : > { %1040 = vst [vmem:[%s1679_s26 + $0xe0] sm:$0xff] %v1008_v13 }
 0x1a9   : > { %1041 = vst [vmem:[%s1679_s26 + $0xe8] sm:$0xff] %v1009_v14 }
 0x1aa   : > { %1042 = vst [vmem:[%s1679_s26 + $0xf0] sm:$0xff] %v1010_v15 }
 0x1ab   : > { %1043 = vst [vmem:[%s1679_s26 + $0xf8] sm:$0xff] %v1011_v16 }
 0x1ac PF: > { %s12_s15 = sadd.s32 1, %s1520_s15   ;;  %s1821_s9 = smov %s1500_s10 }
 0x1ad   : > { %p9_p0 = scmp.ge.s32.totalorder %s12_s15, 6   ;;  %s1822_s10 = smov %s1589_s22 }
 0x1ae   : > { %s1823_s11 = smov %s1512_s13  ;;  %s1824_s12 = smov %s1516_s14 }
 0x1af   : > { %s1825_s13 = smov %s1828_s16  ;;  %s1826_s14 = smov %s1832_s17 }
 0x1b0   :  { %11 = sbr.rel (!%p9_p0) target bundleno = 4 (0x4), region = 112 }

// kernel: gcn_forward.4
= control target key start
LH: loop header
LB: loop body
LE: loop exit
PB: predicated region body
PF: predicated region fallthrough
CT: control target
= control target key end

     0   :  { %s1962_s12 = smov 0   ;;  %s1964_s13 = smov 0   ;;  %s2250_s0 = inlined_call_operand.vmem [shape: bf16[512,512], index: 0, kind: input, shape index: {}]   ;;  %s2251_s1 = inlined_call_operand.vmem [shape: bf16[512,128], index: 1, kind: input, shape index: {}]   ;;  %s2252_s2 = inlined_call_operand.vmem [shape: bf16[128,128], index: 2, kind: input, shape index: {}]   ;;  %s2253_s3 = inlined_call_operand.vmem [shape: bf16[512,128], index: 3, kind: output, shape index: {}]  }
   0x1   :  { %s1966_s14 = smov 0   ;;  %s1968_s15 = smov 0  }
   0x2   :  { %s1970_s16 = smov 0   ;;  %s1972_s17 = smov 0  }
   0x3   :  { %s1974_s18 = smov 0  }
   0x4 LB: > { %s22_s19 = sadd.s32 1, %s1931_s16  ;;  %s25_s20 = sadd.s32 1, %s1935_s17  ;;  %s1939_s18 = sphi %s1974_s18, %s13_s18   ;;  %s1935_s17 = sphi %s1972_s17, %s2259_s17   ;;  %s1931_s16 = sphi %s1970_s16, %s2258_s16   ;;  %s1927_s15 = sphi %s1968_s15, %s2257_s15   ;;  %s1923_s14 = sphi %s1966_s14, %s2256_s14   ;;  %s1919_s13 = sphi %s1964_s13, %s2255_s13   ;;  %s1915_s12 = sphi %s1962_s12, %s2254_s12  }
   0x5   : > { %p23_p0 = scmp.ge.s32.totalorder %s22_s19, 2  ;;  %p41_p1 = scmp.ne.s32.totalorder %s1919_s13, %s1915_s12 }
   0x6   : > { %p42_p2 = scmp.eq.s32.totalorder %s1939_s18, 0  ;;  %s34_s24 = sadd.s32 1, %s1919_s13 }
   0x7   : > { %s2261_s19 = smov (%p23_p0, %s22_s19), 0  ;;  %s2263_s20 = smov (!%p23_p0, %s25_s20), %s1935_s17 }
   0x8   : > { %p43_p3 = por %p42_p2, %p41_p1  ;;  %p27_p4 = scmp.ge.s32.totalorder %s2263_s20, 2 }
   0x9   : > { %s30_s21 = ssub.s32 %s1931_s16, %s2261_s19  ;;  %p1396_p6 = scmp.ge.s32.totalorder %s1939_s18, 4 }
   0xa   : > { %s2265_s20 = smov (%p27_p4, %s2263_s20), 0 }
   0xb   : > { %s29_s22 = ssub.s32 %s1935_s17, %s2265_s20  ;;  %143 = sbr.rel (%p1396_p6) target bundleno = 55 (0x37), region = 20 }
   0xc   : > { %s31_s23 = sor.u32 %s30_s21, %s29_s22 }
   0xd   : > { %p32_p5 = scmp.eq.s32.totalorder %s31_s23, 0 }
   0xf   : > { %s2013_s25 = scalar_select %p32_p5, %s1919_s13, %s34_s24  }
  0x10   : > { %146 = sbr.rel (!%p43_p3) target bundleno = 55 (0x37), region = 24  ;;  %s148_s26 = sand.u32 (%p43_p3), 1, %s1919_s13  }
  0x11   : > { %s1399_s27 = sshll.u32 (%p43_p3), %s1931_s16, 1  ;;  %s1397_s28 = sshll.u32 (%p43_p3), %s148_s26, 8 }
  0x12   : > { %s1636_s29 = sshll.u32 (%p43_p3), %s1935_s17, 7  ;;  %s2027_s8 = scalar_lea.vmem (%p43_p3), [#allocation3], %s1397_s28 }
  0x13   : > { %s154_s30 = sadd.s32 (%p43_p3), %s1636_s29, %s1399_s27 }
  0x14   : > { %s1401_s4 = sshll.u32 (%p43_p3), %s154_s30, 2 }
  0x15   : > { %s2022_s7 = scalar_lea.vmem %s2250_s0, %s1401_s4 }
  0x16   : > { %v247_v0 = vld [vmem:[%s2022_s7] sm:$0xff]  ;;  %v249_v1 = vld [vmem:[%s2022_s7 + $0x10] sm:$0xff] }
  0x17   : > { %v251_v2 = vld [vmem:[%s2022_s7 + $0x20] sm:$0xff]  ;;  %248 = vst [vmem:[%s2027_s8] sm:$0xff] %v247_v0  ;;  %v253_v3 = vld [vmem:[%s2022_s7 + $0x30] sm:$0xff] }
  0x18   : > { %250 = vst [vmem:[%s2027_s8 + $0x8] sm:$0xff] %v249_v1  ;;  %v255_v4 = vld [vmem:[%s2022_s7 + $0x40] sm:$0xff]  ;;  %v257_v5 = vld [vmem:[%s2022_s7 + $0x50] sm:$0xff] }
  0x19   : > { %252 = vst [vmem:[%s2027_s8 + $0x10] sm:$0xff] %v251_v2  ;;  %v259_v6 = vld [vmem:[%s2022_s7 + $0x60] sm:$0xff]  ;;  %v261_v7 = vld [vmem:[%s2022_s7 + $0x70] sm:$0xff] }
  0x1a   : > { %254 = vst [vmem:[%s2027_s8 + $0x18] sm:$0xff] %v253_v3  ;;  %v263_v8 = vld [vmem:[%s2022_s7 + $0x80] sm:$0xff]  ;;  %v265_v9 = vld [vmem:[%s2022_s7 + $0x90] sm:$0xff] }
  0x1b   : > { %256 = vst [vmem:[%s2027_s8 + $0x20] sm:$0xff] %v255_v4  ;;  %v267_v10 = vld [vmem:[%s2022_s7 + $0xa0] sm:$0xff]  ;;  %v269_v11 = vld [vmem:[%s2022_s7 + $0xb0] sm:$0xff] }
  0x1c   : > { %258 = vst [vmem:[%s2027_s8 + $0x28] sm:$0xff] %v257_v5  ;;  %v271_v12 = vld [vmem:[%s2022_s7 + $0xc0] sm:$0xff]  ;;  %v273_v13 = vld [vmem:[%s2022_s7 + $0xd0] sm:$0xff] }
  0x1d   : > { %260 = vst [vmem:[%s2027_s8 + $0x30] sm:$0xff] %v259_v6  ;;  %v275_v14 = vld [vmem:[%s2022_s7 + $0xe0] sm:$0xff]  ;;  %v277_v15 = vld [vmem:[%s2022_s7 + $0xf0] sm:$0xff] }
  0x1e   : > { %262 = vst [vmem:[%s2027_s8 + $0x38] sm:$0xff] %v261_v7  ;;  %v279_v16 = vld [vmem:[%s2022_s7 + $0x100] sm:$0xff]  ;;  %v281_v17 = vld [vmem:[%s2022_s7 + $0x110] sm:$0xff] }
  0x1f   : > { %264 = vst [vmem:[%s2027_s8 + $0x40] sm:$0xff] %v263_v8  ;;  %v283_v18 = vld [vmem:[%s2022_s7 + $0x120] sm:$0xff]  ;;  %v285_v19 = vld [vmem:[%s2022_s7 + $0x130] sm:$0xff] }
  0x20   : > { %266 = vst [vmem:[%s2027_s8 + $0x48] sm:$0xff] %v265_v9  ;;  %v287_v20 = vld [vmem:[%s2022_s7 + $0x140] sm:$0xff]  ;;  %v289_v21 = vld [vmem:[%s2022_s7 + $0x150] sm:$0xff] }
  0x21   : > { %268 = vst [vmem:[%s2027_s8 + $0x50] sm:$0xff] %v267_v10  ;;  %v291_v22 = vld [vmem:[%s2022_s7 + $0x160] sm:$0xff]  ;;  %v293_v23 = vld [vmem:[%s2022_s7 + $0x170] sm:$0xff] }
  0x22   : > { %270 = vst [vmem:[%s2027_s8 + $0x58] sm:$0xff] %v269_v11  ;;  %v295_v24 = vld [vmem:[%s2022_s7 + $0x180] sm:$0xff]  ;;  %v297_v25 = vld [vmem:[%s2022_s7 + $0x190] sm:$0xff] }
  0x23   : > { %272 = vst [vmem:[%s2027_s8 + $0x60] sm:$0xff] %v271_v12  ;;  %v299_v26 = vld [vmem:[%s2022_s7 + $0x1a0] sm:$0xff]  ;;  %v301_v27 = vld [vmem:[%s2022_s7 + $0x1b0] sm:$0xff] }
  0x24   : > { %274 = vst [vmem:[%s2027_s8 + $0x68] sm:$0xff] %v273_v13  ;;  %v303_v28 = vld [vmem:[%s2022_s7 + $0x1c0] sm:$0xff]  ;;  %v305_v29 = vld [vmem:[%s2022_s7 + $0x1d0] sm:$0xff] }
  0x25   : > { %276 = vst [vmem:[%s2027_s8 + $0x70] sm:$0xff] %v275_v14  ;;  %v307_v30 = vld [vmem:[%s2022_s7 + $0x1e0] sm:$0xff]  ;;  %v309_v31 = vld [vmem:[%s2022_s7 + $0x1f0] sm:$0xff] }
  0x26   : > { %278 = vst [vmem:[%s2027_s8 + $0x78] sm:$0xff] %v277_v15 }
  0x27   : > { %280 = vst [vmem:[%s2027_s8 + $0x80] sm:$0xff] %v279_v16 }
  0x28   : > { %282 = vst [vmem:[%s2027_s8 + $0x88] sm:$0xff] %v281_v17 }
  0x29   : > { %284 = vst [vmem:[%s2027_s8 + $0x90] sm:$0xff] %v283_v18 }
  0x2a   : > { %286 = vst [vmem:[%s2027_s8 + $0x98] sm:$0xff] %v285_v19 }
  0x2b   : > { %288 = vst [vmem:[%s2027_s8 + $0xa0] sm:$0xff] %v287_v20 }
  0x2c   : > { %290 = vst [vmem:[%s2027_s8 + $0xa8] sm:$0xff] %v289_v21 }
  0x2d   : > { %292 = vst [vmem:[%s2027_s8 + $0xb0] sm:$0xff] %v291_v22 }
  0x2e   : > { %294 = vst [vmem:[%s2027_s8 + $0xb8] sm:$0xff] %v293_v23 }
  0x2f   : > { %296 = vst [vmem:[%s2027_s8 + $0xc0] sm:$0xff] %v295_v24 }
  0x30   : > { %298 = vst [vmem:[%s2027_s8 + $0xc8] sm:$0xff] %v297_v25 }
  0x31   : > { %300 = vst [vmem:[%s2027_s8 + $0xd0] sm:$0xff] %v299_v26 }
  0x32   : > { %302 = vst [vmem:[%s2027_s8 + $0xd8] sm:$0xff] %v301_v27 }
  0x33   : > { %304 = vst [vmem:[%s2027_s8 + $0xe0] sm:$0xff] %v303_v28 }
  0x34   : > { %306 = vst [vmem:[%s2027_s8 + $0xe8] sm:$0xff] %v305_v29 }
  0x35   : > { %308 = vst [vmem:[%s2027_s8 + $0xf0] sm:$0xff] %v307_v30 }
  0x36   : > { %310 = vst [vmem:[%s2027_s8 + $0xf8] sm:$0xff] %v309_v31 }
  0x37 PF: > { %p1402_p7 = scmp.ge.s32.totalorder %s1939_s18, 1  ;;  %p324_p8 = scmp.lt.s32.totalorder %s1939_s18, 5 }
  0x39   : > { %p325_p9 = pnand %p1402_p7, %p324_p8 }
  0x3a   : > { %s331_s9 = sand.u32 (!%p325_p9), 1, %s1915_s12   ;;  %s1404_s10 = sshll.u32 (!%p325_p9), %s1923_s14, 5 }
  0x3b   : > { %328 = sbr.rel (%p325_p9) target bundleno = 620 (0x26c), region = 66  ;;  %s1403_s11 = sshll.u32 (!%p325_p9), %s331_s9, 8 }
  0x3c   : > { %p362_p10 = scmp.lt.s32.totalorder (!%p325_p9), %s1404_s10, 63  ;;  %s1406_s21 = sshll.u32 (!%p325_p9), %s1927_s15, 5 }
  0x3d   : > { %p368_p11 = scmp.lt.s32.totalorder (!%p325_p9), %s1406_s21, 63  ;;  %s2105_s12 = scalar_lea.vmem (!%p325_p9), [#allocation3], %s1403_s11 }
  0x3e   : > { %p1408_p12 = scmp.ne.s32.totalorder (!%p325_p9), %s1923_s14, 0 }
  0x40   : > { %s2267_s10 = smov (!%p362_p10, %s1404_s10), 63  ;;  %s2269_s21 = smov (!%p368_p11, %s1406_s21), 63 }
  0x41   : > { %s1405_s22 = sshll.u32 %s2267_s10, 2  ;;  %s1407_s27 = sshll.u32 %s2269_s21, 2 }
  0x42   : > { %s2098_s26 = scalar_lea.vmem %s2251_s1, %s1405_s22  ;;  %s2103_s30 = scalar_lea.vmem %s2253_s3, %s1407_s27 }
  0x43   : > { %376 = sbr.rel (%p1408_p12) target bundleno = 105 (0x69), region = 74 }
  0x48   : > { %v1941_v32 = vmov 0.0  }
  0x49   : > { %377 = vst [vmem:[#allocation2 + $0xb0] sm:$0xff] %v1941_v32 }
  0x4a   : > { %378 = vst [vmem:[#allocation2] sm:$0xff] %v1941_v32 }
  0x4b   : > { %379 = vst [vmem:[#allocation2 + $0xd8] sm:$0xff] %v1941_v32 }
  0x4c   : > { %380 = vst [vmem:[#allocation2 + $0x18] sm:$0xff] %v1941_v32 }
  0x4d   : > { %381 = vst [vmem:[#allocation2 + $0x50] sm:$0xff] %v1941_v32 }
  0x4e   : > { %382 = vst [vmem:[#allocation2 + $0x68] sm:$0xff] %v1941_v32 }
  0x4f   : > { %383 = vst [vmem:[#allocation2 + $0x30] sm:$0xff] %v1941_v32 }
  0x50   : > { %384 = vst [vmem:[#allocation2 + $0x48] sm:$0xff] %v1941_v32 }
  0x51   : > { %385 = vst [vmem:[#allocation2 + $0x80] sm:$0xff] %v1941_v32 }
  0x52   : > { %386 = vst [vmem:[#allocation2 + $0x88] sm:$0xff] %v1941_v32 }
  0x53   : > { %387 = vst [vmem:[#allocation2 + $0xe8] sm:$0xff] %v1941_v32 }
  0x54   : > { %388 = vst [vmem:[#allocation2 + $0xb8] sm:$0xff] %v1941_v32 }
  0x55   : > { %389 = vst [vmem:[#allocation2 + $0x60] sm:$0xff] %v1941_v32 }
  0x56   : > { %390 = vst [vmem:[#allocation2 + $0xf0] sm:$0xff] %v1941_v32 }
  0x57   : > { %391 = vst [vmem:[#allocation2 + $0x8] sm:$0xff] %v1941_v32 }
  0x58   : > { %392 = vst [vmem:[#allocation2 + $0x78] sm:$0xff] %v1941_v32 }
  0x59   : > { %393 = vst [vmem:[#allocation2 + $0x38] sm:$0xff] %v1941_v32 }
  0x5a   : > { %394 = vst [vmem:[#allocation2 + $0x58] sm:$0xff] %v1941_v32 }
  0x5b   : > { %395 = vst [vmem:[#allocation2 + $0x40] sm:$0xff] %v1941_v32 }
  0x5c   : > { %396 = vst [vmem:[#allocation2 + $0xc8] sm:$0xff] %v1941_v32 }
  0x5d   : > { %397 = vst [vmem:[#allocation2 + $0xe0] sm:$0xff] %v1941_v32 }
  0x5e   : > { %398 = vst [vmem:[#allocation2 + $0x90] sm:$0xff] %v1941_v32 }
  0x5f   : > { %399 = vst [vmem:[#allocation2 + $0x70] sm:$0xff] %v1941_v32 }
  0x60   : > { %400 = vst [vmem:[#allocation2 + $0xc0] sm:$0xff] %v1941_v32 }
  0x61   : > { %401 = vst [vmem:[#allocation2 + $0xa8] sm:$0xff] %v1941_v32 }
  0x62   : > { %402 = vst [vmem:[#allocation2 + $0xd0] sm:$0xff] %v1941_v32 }
  0x63   : > { %403 = vst [vmem:[#allocation2 + $0x10] sm:$0xff] %v1941_v32 }
  0x64   : > { %404 = vst [vmem:[#allocation2 + $0x28] sm:$0xff] %v1941_v32 }
  0x65   : > { %405 = vst [vmem:[#allocation2 + $0xa0] sm:$0xff] %v1941_v32 }
  0x66   : > { %406 = vst [vmem:[#allocation2 + $0xf8] sm:$0xff] %v1941_v32 }
  0x67   : > { %407 = vst [vmem:[#allocation2 + $0x20] sm:$0xff] %v1941_v32 }
  0x68   : > { %408 = vst [vmem:[#allocation2 + $0x98] sm:$0xff] %v1941_v32 }
  0x69 PF: > { %v1676_v33 = vld [vmem:[%s2098_s26 + $0x38] sm:$0xff]  ;;  %v1675_v35 = vld [vmem:[%s2098_s26 + $0x30] sm:$0xff]  ;;  %v1674_v37 = vld [vmem:[%s2098_s26 + $0x28] sm:$0xff]  ;;  %p1601_p13 = scmp.ne.s32.totalorder %s1923_s14, 1 }
  0x6a   : > { %v1684_v34 = vld [vmem:[%s2098_s26 + $0x78] sm:$0xff]  ;;  %761 = vmatpush.bf16.msra.mxu0 %v1676_v33  ;;  %1788 = vmatpush.bf16.msra.mxu2 %v1676_v33  ;;  %v1683_v36 = vld [vmem:[%s2098_s26 + $0x70] sm:$0xff]  ;;  %v1682_v38 = vld [vmem:[%s2098_s26 + $0x68] sm:$0xff] }
  0x6b   : > { %850 = vmatpush.bf16.msra.mxu1 %v1684_v34  ;;  %1796 = vmatpush.bf16.msra.mxu3 %v1684_v34  ;;  %v1673_v39 = vld [vmem:[%s2098_s26 + $0x20] sm:$0xff]  ;;  %v1672_v41 = vld [vmem:[%s2098_s26 + $0x18] sm:$0xff]  ;;  %v1671_v43 = vld [vmem:[%s2098_s26 + $0x10] sm:$0xff] }
  0x6c   : > { %v1681_v40 = vld [vmem:[%s2098_s26 + $0x60] sm:$0xff]  ;;  %v1680_v42 = vld [vmem:[%s2098_s26 + $0x58] sm:$0xff]  ;;  %v1679_v44 = vld [vmem:[%s2098_s26 + $0x50] sm:$0xff] }
  0x6d   : > { %v1670_v45 = vld [vmem:[%s2098_s26 + $0x8] sm:$0xff]  ;;  %v1669_v47 = vld [vmem:[%s2098_s26] sm:$0xff]  ;;  %v1419_v61 = vld [vmem:[%s2105_s12 + $0x10] sm:$0xf] }
  0x6e   : > { %762 = vmatpush.bf16.msra.mxu0 %v1675_v35  ;;  %1789 = vmatpush.bf16.msra.mxu2 %v1675_v35  ;;  %v1678_v46 = vld [vmem:[%s2098_s26 + $0x48] sm:$0xff]  ;;  %v1677_v48 = vld [vmem:[%s2098_s26 + $0x40] sm:$0xff]  ;;  %v1640_v62 = vld [vmem:[%s2105_s12 + $0x14] sm:$0xf0] }
  0x6f   : > { %851 = vmatpush.bf16.msra.mxu1 %v1683_v36  ;;  %1797 = vmatpush.bf16.msra.mxu3 %v1683_v36  ;;  %v1411_v49 = vld [vmem:[%s2105_s12] sm:$0xf]  ;;  %v1638_v50 = vld [vmem:[%s2105_s12 + $0x4] sm:$0xf0]  ;;  %v1637_v53 = vld [vmem:[%s2105_s12 + $0x4] sm:$0xf]  ;;  %v1420_v5 = vor.u32 %v1640_v62, %v1419_v61 }
  0x70   : > { %v1475_v51 = vld [vmem:[%s2105_s12 + $0x80] sm:$0xf]  ;;  %v1654_v52 = vld [vmem:[%s2105_s12 + $0x84] sm:$0xf0]  ;;  %v1413_v54 = vld [vmem:[%s2105_s12 + $0x8] sm:$0xf0]  ;;  %v1412_v57 = vor.u32 %v1638_v50, %v1411_v49 }
  0x71   : > { %v1653_v55 = vld [vmem:[%s2105_s12 + $0x84] sm:$0xf]  ;;  %v1477_v56 = vld [vmem:[%s2105_s12 + $0x88] sm:$0xf0]  ;;  %v1476_v58 = vor.u32 %v1654_v52, %v1475_v51  ;;  %v1416_v59 = vor.u32 %v1637_v53, %v1413_v54  ;;  %v1483_v63 = vld [vmem:[%s2105_s12 + $0x90] sm:$0xf] }
  0x72   : > { %763 = vmatpush.bf16.msra.mxu0 %v1674_v37  ;;  %1790 = vmatpush.bf16.msra.mxu2 %v1674_v37  ;;  %v1480_v60 = vor.u32 %v1653_v55, %v1477_v56  ;;  %v1656_v0 = vld [vmem:[%s2105_s12 + $0x94] sm:$0xf0]  ;;  %v1639_v1 = vld [vmem:[%s2105_s12 + $0x14] sm:$0xf]  ;;  %v1421_v2 = vld [vmem:[%s2105_s12 + $0x18] sm:$0xf0] }
  0x73   : > { %852 = vmatpush.bf16.msra.mxu1 %v1682_v38  ;;  %1798 = vmatpush.bf16.msra.mxu3 %v1682_v38  ;;  %v1655_v3 = vld [vmem:[%s2105_s12 + $0x94] sm:$0xf]  ;;  %v1485_v4 = vld [vmem:[%s2105_s12 + $0x98] sm:$0xf0]  ;;  %v1484_v6 = vor.u32 %v1656_v0, %v1483_v63  ;;  %v1424_v7 = vor.u32 %v1639_v1, %v1421_v2  ;;  %v1427_v9 = vld [vmem:[%s2105_s12 + $0x20] sm:$0xf] }
  0x74   : > { %v1488_v8 = vor.u32 %v1655_v3, %v1485_v4  ;;  %v1642_v10 = vld [vmem:[%s2105_s12 + $0x24] sm:$0xf0]  ;;  %v1491_v11 = vld [vmem:[%s2105_s12 + $0xa0] sm:$0xf]  ;;  %v1641_v13 = vld [vmem:[%s2105_s12 + $0x24] sm:$0xf] }
  0x75   : > { %v1658_v12 = vld [vmem:[%s2105_s12 + $0xa4] sm:$0xf0]  ;;  %v1429_v14 = vld [vmem:[%s2105_s12 + $0x28] sm:$0xf0]  ;;  %v1657_v15 = vld [vmem:[%s2105_s12 + $0xa4] sm:$0xf]  ;;  %v1428_v17 = vor.u32 %v1642_v10, %v1427_v9 }
  0x76   : > { %764 = vmatpush.bf16.msra.mxu0 %v1673_v39  ;;  %1791 = vmatpush.bf16.msra.mxu2 %v1673_v39  ;;  %v1493_v16 = vld [vmem:[%s2105_s12 + $0xa8] sm:$0xf0]  ;;  %v1492_v18 = vor.u32 %v1658_v12, %v1491_v11  ;;  %v1432_v19 = vor.u32 %v1641_v13, %v1429_v14  ;;  %v1435_v21 = vld [vmem:[%s2105_s12 + $0x30] sm:$0xf]  ;;  %v1644_v22 = vld [vmem:[%s2105_s12 + $0x34] sm:$0xf0] }
  0x77   : > { %853 = vmatpush.bf16.msra.mxu1 %v1681_v40  ;;  %1799 = vmatpush.bf16.msra.mxu3 %v1681_v40  ;;  %v1496_v20 = vor.u32 %v1657_v15, %v1493_v16  ;;  %v1499_v23 = vld [vmem:[%s2105_s12 + $0xb0] sm:$0xf]  ;;  %v1660_v24 = vld [vmem:[%s2105_s12 + $0xb4] sm:$0xf0]  ;;  %v1643_v25 = vld [vmem:[%s2105_s12 + $0x34] sm:$0xf]  ;;  %v1436_v29 = vor.u32 %v1644_v22, %v1435_v21 }
  0x78   : > { %v1437_v26 = vld [vmem:[%s2105_s12 + $0x38] sm:$0xf0]  ;;  %v1659_v27 = vld [vmem:[%s2105_s12 + $0xb4] sm:$0xf]  ;;  %v1500_v30 = vor.u32 %v1660_v24, %v1499_v23  ;;  %v1443_v33 = vld [vmem:[%s2105_s12 + $0x40] sm:$0xf] }
  0x79   : > { %v1501_v28 = vld [vmem:[%s2105_s12 + $0xb8] sm:$0xf0]  ;;  %v1440_v31 = vor.u32 %v1643_v25, %v1437_v26  ;;  %v1646_v34 = vld [vmem:[%s2105_s12 + $0x44] sm:$0xf0]  ;;  %v1507_v35 = vld [vmem:[%s2105_s12 + $0xc0] sm:$0xf] }
  0x7a   : > { %765 = vmatpush.bf16.msra.mxu0 %v1672_v41  ;;  %1792 = vmatpush.bf16.msra.mxu2 %v1672_v41  ;;  %v1504_v32 = vor.u32 %v1659_v27, %v1501_v28  ;;  %v1662_v36 = vld [vmem:[%s2105_s12 + $0xc4] sm:$0xf0]  ;;  %v1645_v37 = vld [vmem:[%s2105_s12 + $0x44] sm:$0xf]  ;;  %v1445_v38 = vld [vmem:[%s2105_s12 + $0x48] sm:$0xf0]  ;;  %v1444_v41 = vor.u32 %v1646_v34, %v1443_v33 }
  0x7b   : > { %854 = vmatpush.bf16.msra.mxu1 %v1680_v42  ;;  %1800 = vmatpush.bf16.msra.mxu3 %v1680_v42  ;;  %v1661_v39 = vld [vmem:[%s2105_s12 + $0xc4] sm:$0xf]  ;;  %v1509_v40 = vld [vmem:[%s2105_s12 + $0xc8] sm:$0xf0]  ;;  %v1508_v42 = vor.u32 %v1662_v36, %v1507_v35  ;;  %v1647_v49 = vld [vmem:[%s2105_s12 + $0x54] sm:$0xf] }
  0x7c   : > { %v1453_v50 = vld [vmem:[%s2105_s12 + $0x58] sm:$0xf0]  ;;  %v1663_v51 = vld [vmem:[%s2105_s12 + $0xd4] sm:$0xf]  ;;  %v1649_v61 = vld [vmem:[%s2105_s12 + $0x64] sm:$0xf] }
  0x7d   : > { %v1517_v52 = vld [vmem:[%s2105_s12 + $0xd8] sm:$0xf0]  ;;  %v1456_v55 = vor.u32 %v1647_v49, %v1453_v50  ;;  %v1461_v62 = vld [vmem:[%s2105_s12 + $0x68] sm:$0xf0]  ;;  %v1665_v63 = vld [vmem:[%s2105_s12 + $0xe4] sm:$0xf] }
  0x7e   : > { %766 = vmatpush.bf16.msra.mxu0 %v1671_v43  ;;  %1793 = vmatpush.bf16.msra.mxu2 %v1671_v43  ;;  %v1448_v43 = vor.u32 %v1645_v37, %v1445_v38  ;;  %v1520_v56 = vor.u32 %v1663_v51, %v1517_v52  ;;  %v1525_v0 = vld [vmem:[%s2105_s12 + $0xe8] sm:$0xf0]  ;;  %v1464_v3 = vor.u32 %v1649_v61, %v1461_v62  ;;  %v1651_v9 = vld [vmem:[%s2105_s12 + $0x74] sm:$0xf]  ;;  %v1469_v10 = vld [vmem:[%s2105_s12 + $0x78] sm:$0xf0] }
  0x7f   : > { %855 = vmatpush.bf16.msra.mxu1 %v1679_v44  ;;  %1801 = vmatpush.bf16.msra.mxu3 %v1679_v44  ;;  %v1512_v44 = vor.u32 %v1661_v39, %v1509_v40  ;;  %v1528_v4 = vor.u32 %v1665_v63, %v1525_v0  ;;  %v1667_v11 = vld [vmem:[%s2105_s12 + $0xf4] sm:$0xf]  ;;  %v1533_v12 = vld [vmem:[%s2105_s12 + $0xf8] sm:$0xf0]  ;;  %v1472_v15 = vor.u32 %v1651_v9, %v1469_v10  ;;  %v410_v27 = vld [vmem:[#allocation2] sm:$0xff] }
  0x80   : > { %v1536_v16 = vor.u32 %v1667_v11, %v1533_v12  ;;  %v425_v23 = vld [vmem:[#allocation2 + $0x38] sm:$0xff]  ;;  %v429_v63 = vld [vmem:[#allocation2 + $0xe0] sm:$0xff]  ;;  %v430_v9 = vld [vmem:[#allocation2 + $0x90] sm:$0xff] }
  0x81   : > { %v426_v33 = vld [vmem:[#allocation2 + $0x58] sm:$0xff] }
  0x82   : > { %767 = vmatpush.bf16.msra.mxu0 %v1670_v45  ;;  %1794 = vmatpush.bf16.msra.mxu2 %v1670_v45  ;;  %v1451_v45 = vld [vmem:[%s2105_s12 + $0x50] sm:$0xf]  ;;  %v411_v37 = vld [vmem:[#allocation2 + $0xd8] sm:$0xff] }
  0x83   : > { %856 = vmatpush.bf16.msra.mxu1 %v1678_v46  ;;  %1802 = vmatpush.bf16.msra.mxu3 %v1678_v46  ;;  %v1648_v46 = vld [vmem:[%s2105_s12 + $0x54] sm:$0xf0] }
  0x84   : > { %v1452_v53 = vor.u32 %v1648_v46, %v1451_v45 }
  0x86   : > { %768 = vmatpush.bf16.msra.mxu0 %v1669_v47  ;;  %1795 = vmatpush.bf16.msra.mxu2 %v1669_v47  ;;  %v1515_v47 = vld [vmem:[%s2105_s12 + $0xd0] sm:$0xf] }
  0x87   : > { %857 = vmatpush.bf16.msra.mxu1 %v1677_v48  ;;  %1803 = vmatpush.bf16.msra.mxu3 %v1677_v48  ;;  %v1664_v48 = vld [vmem:[%s2105_s12 + $0xd4] sm:$0xf0] }
  0x88   : > { %v1516_v54 = vor.u32 %v1664_v48, %v1515_v47  ;;  %v412_v47 = vld [vmem:[#allocation2 + $0x18] sm:$0xff] }
  0x89   : > { %769 = vmatmul.bf16.vlgmr.msra.gmra.mxu0 %v1412_v57  ;;  %809 = vmatmul.bf16.vlgmr.msra.gmra.mxu2 %v1476_v58  ;;  %v1459_v57 = vld [vmem:[%s2105_s12 + $0x60] sm:$0xf]  ;;  %v1650_v58 = vld [vmem:[%s2105_s12 + $0x64] sm:$0xf0] }
  0x8a   : > { %858 = vmatmul.bf16.vlgmr.msra.gmra.mxu1 %v1416_v59  ;;  %898 = vmatmul.bf16.vlgmr.msra.gmra.mxu3 %v1480_v60  ;;  %v1523_v59 = vld [vmem:[%s2105_s12 + $0xe0] sm:$0xf]  ;;  %v1666_v60 = vld [vmem:[%s2105_s12 + $0xe4] sm:$0xf0]  ;;  %v1460_v1 = vor.u32 %v1650_v58, %v1459_v57  ;;  %v413_v57 = vld [vmem:[#allocation2 + $0x50] sm:$0xff] }
  0x8b   : > { %v1524_v2 = vor.u32 %v1666_v60, %v1523_v59 }
  0x99   : > { %774 = vmatmul.bf16.gmra.mxu0 %v1420_v5  ;;  %814 = vmatmul.bf16.gmra.mxu2 %v1484_v6  ;;  %v1467_v5 = vld [vmem:[%s2105_s12 + $0x70] sm:$0xf]  ;;  %v1652_v6 = vld [vmem:[%s2105_s12 + $0x74] sm:$0xf0] }
  0x9a   : > { %863 = vmatmul.bf16.gmra.mxu1 %v1424_v7  ;;  %903 = vmatmul.bf16.gmra.mxu3 %v1488_v8  ;;  %v1531_v7 = vld [vmem:[%s2105_s12 + $0xf0] sm:$0xf]  ;;  %v1668_v8 = vld [vmem:[%s2105_s12 + $0xf4] sm:$0xf0]  ;;  %v1468_v13 = vor.u32 %v1652_v6, %v1467_v5 }
  0x9b   : > { %v1532_v14 = vor.u32 %v1668_v8, %v1531_v7 }
  0xa9   : > { %779 = vmatmul.bf16.gmra.mxu0 %v1428_v17  ;;  %819 = vmatmul.bf16.gmra.mxu2 %v1492_v18  ;;  %v409_v18 = vld [vmem:[#allocation2 + $0xb0] sm:$0xff] }
  0xaa   : > { %868 = vmatmul.bf16.gmra.mxu1 %v1432_v19  ;;  %908 = vmatmul.bf16.gmra.mxu3 %v1496_v20 }
  0xb9   : > { %784 = vmatmul.bf16.gmra.mxu0 %v1436_v29  ;;  %824 = vmatmul.bf16.gmra.mxu2 %v1500_v30 }
  0xba   : > { %873 = vmatmul.bf16.gmra.mxu1 %v1440_v31  ;;  %913 = vmatmul.bf16.gmra.mxu3 %v1504_v32 }
  0xc9   : > { %789 = vmatmul.bf16.gmra.mxu0 %v1444_v41  ;;  %829 = vmatmul.bf16.gmra.mxu2 %v1508_v42 }
  0xca   : > { %878 = vmatmul.bf16.gmra.mxu1 %v1448_v43  ;;  %918 = vmatmul.bf16.gmra.mxu3 %v1512_v44  ;;  %v427_v43 = vld [vmem:[#allocation2 + $0x40] sm:$0xff] }
  0xd9   : > { %794 = vmatmul.bf16.gmra.mxu0 %v1452_v53  ;;  %834 = vmatmul.bf16.gmra.mxu2 %v1516_v54  ;;  %v428_v53 = vld [vmem:[#allocation2 + $0xc8] sm:$0xff] }
  0xda   : > { %883 = vmatmul.bf16.gmra.mxu1 %v1456_v55  ;;  %923 = vmatmul.bf16.gmra.mxu3 %v1520_v56 }
  0xe9   : > { %799 = vmatmul.bf16.gmra.mxu0 %v1460_v1  ;;  %839 = vmatmul.bf16.gmra.mxu2 %v1524_v2 }
  0xea   : > { %888 = vmatmul.bf16.gmra.mxu1 %v1464_v3  ;;  %928 = vmatmul.bf16.gmra.mxu3 %v1528_v4  ;;  %v414_v3 = vld [vmem:[#allocation2 + $0x68] sm:$0xff] }
  0xf9   : > { %804 = vmatmul.bf16.gmra.mxu0 %v1468_v13  ;;  %844 = vmatmul.bf16.gmra.mxu2 %v1532_v14  ;;  %v415_v13 = vld [vmem:[#allocation2 + $0x30] sm:$0xff] }
  0xfa   : > { %893 = vmatmul.bf16.gmra.mxu1 %v1472_v15  ;;  %933 = vmatmul.bf16.gmra.mxu3 %v1536_v16 }
 0x106   : > { %v770_v17 = vpop.f32.mrf.mxu0 }
 0x107   : > { %v859_v19 = vpop.f32.mrf.mxu1 }
 0x108   : > { %v860_v20 = vadd.f32 %v859_v19, %v770_v17  ;;  %v431_v19 = vld [vmem:[#allocation2 + $0x70] sm:$0xff] }
 0x10a   : > { %v939_v21 = vadd.f32 %v860_v20, %v409_v18 }
 0x10c   : > { %971 = vst [vmem:[#allocation2 + $0xb0] sm:$0xff] %v939_v21  ;;  %v810_v22 = vpop.f32.mrf.mxu2 }
 0x10d   : > { %v899_v24 = vpop.f32.mrf.mxu3 }
 0x10e   : > { %v900_v25 = vadd.f32 %v899_v24, %v810_v22  ;;  %v772_v26 = vpop.f32.mrf.mxu0 }
 0x10f   : > { %v861_v28 = vpop.f32.mrf.mxu1 }
 0x110   : > { %v955_v29 = vadd.f32 %v900_v25, %v425_v23  ;;  %v862_v30 = vadd.f32 %v861_v28, %v772_v26  ;;  %v416_v23 = vld [vmem:[#allocation2 + $0x48] sm:$0xff] }
 0x112   : > { %987 = vst [vmem:[#allocation2 + $0x38] sm:$0xff] %v955_v29  ;;  %v940_v31 = vadd.f32 %v862_v30, %v410_v27  ;;  %v432_v29 = vld [vmem:[#allocation2 + $0xc0] sm:$0xff] }
 0x114   : > { %972 = vst [vmem:[#allocation2] sm:$0xff] %v940_v31  ;;  %v812_v32 = vpop.f32.mrf.mxu2 }
 0x115   : > { %v901_v34 = vpop.f32.mrf.mxu3 }
 0x116   : > { %v902_v35 = vadd.f32 %v901_v34, %v812_v32  ;;  %v775_v36 = vpop.f32.mrf.mxu0 }
 0x117   : > { %v864_v38 = vpop.f32.mrf.mxu1 }
 0x118   : > { %v956_v39 = vadd.f32 %v902_v35, %v426_v33  ;;  %v865_v40 = vadd.f32 %v864_v38, %v775_v36  ;;  %v417_v33 = vld [vmem:[#allocation2 + $0x80] sm:$0xff] }
 0x11a   : > { %988 = vst [vmem:[#allocation2 + $0x58] sm:$0xff] %v956_v39  ;;  %v941_v41 = vadd.f32 %v865_v40, %v411_v37  ;;  %v433_v39 = vld [vmem:[#allocation2 + $0xa8] sm:$0xff] }
 0x11c   : > { %973 = vst [vmem:[#allocation2 + $0xd8] sm:$0xff] %v941_v41  ;;  %v815_v42 = vpop.f32.mrf.mxu2 }
 0x11d   : > { %v904_v44 = vpop.f32.mrf.mxu3 }
 0x11e   : > { %v905_v45 = vadd.f32 %v904_v44, %v815_v42  ;;  %v777_v46 = vpop.f32.mrf.mxu0 }
 0x11f   : > { %v866_v48 = vpop.f32.mrf.mxu1 }
 0x120   : > { %v957_v49 = vadd.f32 %v905_v45, %v427_v43  ;;  %v867_v50 = vadd.f32 %v866_v48, %v777_v46  ;;  %v418_v43 = vld [vmem:[#allocation2 + $0x88] sm:$0xff] }
 0x122   : > { %989 = vst [vmem:[#allocation2 + $0x40] sm:$0xff] %v957_v49  ;;  %v942_v51 = vadd.f32 %v867_v50, %v412_v47  ;;  %v434_v49 = vld [vmem:[#allocation2 + $0xd0] sm:$0xff] }
 0x124   : > { %974 = vst [vmem:[#allocation2 + $0x18] sm:$0xff] %v942_v51  ;;  %v817_v52 = vpop.f32.mrf.mxu2 }
 0x125   : > { %v906_v54 = vpop.f32.mrf.mxu3 }
 0x126   : > { %v907_v55 = vadd.f32 %v906_v54, %v817_v52  ;;  %v780_v56 = vpop.f32.mrf.mxu0 }
 0x127   : > { %v869_v58 = vpop.f32.mrf.mxu1 }
 0x128   : > { %v958_v59 = vadd.f32 %v907_v55, %v428_v53  ;;  %v870_v60 = vadd.f32 %v869_v58, %v780_v56  ;;  %v419_v53 = vld [vmem:[#allocation2 + $0xe8] sm:$0xff] }
 0x12a   : > { %990 = vst [vmem:[#allocation2 + $0xc8] sm:$0xff] %v958_v59  ;;  %v943_v61 = vadd.f32 %v870_v60, %v413_v57  ;;  %v435_v59 = vld [vmem:[#allocation2 + $0x10] sm:$0xff] }
 0x12c   : > { %975 = vst [vmem:[#allocation2 + $0x50] sm:$0xff] %v943_v61  ;;  %v820_v62 = vpop.f32.mrf.mxu2 }
 0x12d   : > { %v909_v0 = vpop.f32.mrf.mxu3 }
 0x12e   : > { %v910_v1 = vadd.f32 %v909_v0, %v820_v62  ;;  %v782_v2 = vpop.f32.mrf.mxu0 }
 0x12f   : > { %v871_v4 = vpop.f32.mrf.mxu1 }
 0x130   : > { %v959_v5 = vadd.f32 %v910_v1, %v429_v63  ;;  %v872_v6 = vadd.f32 %v871_v4, %v782_v2  ;;  %v420_v63 = vld [vmem:[#allocation2 + $0xb8] sm:$0xff] }
 0x132   : > { %991 = vst [vmem:[#allocation2 + $0xe0] sm:$0xff] %v959_v5  ;;  %v944_v7 = vadd.f32 %v872_v6, %v414_v3  ;;  %v436_v5 = vld [vmem:[#allocation2 + $0x28] sm:$0xff] }
 0x134   : > { %976 = vst [vmem:[#allocation2 + $0x68] sm:$0xff] %v944_v7  ;;  %v822_v8 = vpop.f32.mrf.mxu2 }
 0x135   : > { %v911_v10 = vpop.f32.mrf.mxu3 }
 0x136   : > { %v912_v11 = vadd.f32 %v911_v10, %v822_v8  ;;  %v785_v12 = vpop.f32.mrf.mxu0 }
 0x137   : > { %v874_v14 = vpop.f32.mrf.mxu1 }
 0x138   : > { %v960_v15 = vadd.f32 %v912_v11, %v430_v9  ;;  %v875_v16 = vadd.f32 %v874_v14, %v785_v12  ;;  %v421_v9 = vld [vmem:[#allocation2 + $0x60] sm:$0xff] }
 0x13a   : > { %992 = vst [vmem:[#allocation2 + $0x90] sm:$0xff] %v960_v15  ;;  %v945_v17 = vadd.f32 %v875_v16, %v415_v13  ;;  %v437_v15 = vld [vmem:[#allocation2 + $0xa0] sm:$0xff] }
 0x13c   : > { %977 = vst [vmem:[#allocation2 + $0x30] sm:$0xff] %v945_v17  ;;  %v825_v18 = vpop.f32.mrf.mxu2 }
 0x13d   : > { %v914_v20 = vpop.f32.mrf.mxu3 }
 0x13e   : > { %v915_v21 = vadd.f32 %v914_v20, %v825_v18  ;;  %v787_v22 = vpop.f32.mrf.mxu0 }
 0x13f   : > { %v876_v24 = vpop.f32.mrf.mxu1 }
 0x140   : > { %v961_v25 = vadd.f32 %v915_v21, %v431_v19  ;;  %v877_v26 = vadd.f32 %v876_v24, %v787_v22  ;;  %v422_v19 = vld [vmem:[#allocation2 + $0xf0] sm:$0xff] }
 0x142   : > { %993 = vst [vmem:[#allocation2 + $0x70] sm:$0xff] %v961_v25  ;;  %v946_v27 = vadd.f32 %v877_v26, %v416_v23  ;;  %v438_v25 = vld [vmem:[#allocation2 + $0xf8] sm:$0xff] }
 0x144   : > { %978 = vst [vmem:[#allocation2 + $0x48] sm:$0xff] %v946_v27  ;;  %v827_v28 = vpop.f32.mrf.mxu2 }
 0x145   : > { %v916_v30 = vpop.f32.mrf.mxu3 }
 0x146   : > { %v917_v31 = vadd.f32 %v916_v30, %v827_v28  ;;  %v790_v32 = vpop.f32.mrf.mxu0 }
 0x147   : > { %v879_v34 = vpop.f32.mrf.mxu1 }
 0x148   : > { %v962_v35 = vadd.f32 %v917_v31, %v432_v29  ;;  %v880_v36 = vadd.f32 %v879_v34, %v790_v32  ;;  %v423_v29 = vld [vmem:[#allocation2 + $0x8] sm:$0xff] }
 0x14a   : > { %994 = vst [vmem:[#allocation2 + $0xc0] sm:$0xff] %v962_v35  ;;  %v947_v37 = vadd.f32 %v880_v36, %v417_v33  ;;  %v439_v35 = vld [vmem:[#allocation2 + $0x20] sm:$0xff] }
 0x14c   : > { %979 = vst [vmem:[#allocation2 + $0x80] sm:$0xff] %v947_v37  ;;  %v830_v38 = vpop.f32.mrf.mxu2 }
 0x14d   : > { %v919_v40 = vpop.f32.mrf.mxu3 }
 0x14e   : > { %v920_v41 = vadd.f32 %v919_v40, %v830_v38  ;;  %v792_v42 = vpop.f32.mrf.mxu0 }
 0x14f   : > { %v881_v44 = vpop.f32.mrf.mxu1 }
 0x150   : > { %v963_v45 = vadd.f32 %v920_v41, %v433_v39  ;;  %v882_v46 = vadd.f32 %v881_v44, %v792_v42  ;;  %v424_v39 = vld [vmem:[#allocation2 + $0x78] sm:$0xff] }
 0x152   : > { %995 = vst [vmem:[#allocation2 + $0xa8] sm:$0xff] %v963_v45  ;;  %v948_v47 = vadd.f32 %v882_v46, %v418_v43  ;;  %v440_v45 = vld [vmem:[#allocation2 + $0x98] sm:$0xff] }
 0x154   : > { %980 = vst [vmem:[#allocation2 + $0x88] sm:$0xff] %v948_v47  ;;  %v832_v48 = vpop.f32.mrf.mxu2 }
 0x155   : > { %v921_v50 = vpop.f32.mrf.mxu3 }
 0x156   : > { %v922_v51 = vadd.f32 %v921_v50, %v832_v48  ;;  %v795_v52 = vpop.f32.mrf.mxu0 }
 0x157   : > { %v884_v54 = vpop.f32.mrf.mxu1 }
 0x158   : > { %v964_v55 = vadd.f32 %v922_v51, %v434_v49  ;;  %v885_v56 = vadd.f32 %v884_v54, %v795_v52 }
 0x15a   : > { %996 = vst [vmem:[#allocation2 + $0xd0] sm:$0xff] %v964_v55  ;;  %v949_v57 = vadd.f32 %v885_v56, %v419_v53 }
 0x15c   : > { %981 = vst [vmem:[#allocation2 + $0xe8] sm:$0xff] %v949_v57  ;;  %v835_v58 = vpop.f32.mrf.mxu2 }
 0x15d   : > { %v924_v60 = vpop.f32.mrf.mxu3 }
 0x15e   : > { %v925_v61 = vadd.f32 %v924_v60, %v835_v58  ;;  %v797_v62 = vpop.f32.mrf.mxu0 }
 0x15f   : > { %v886_v0 = vpop.f32.mrf.mxu1 }
 0x160   : > { %v965_v1 = vadd.f32 %v925_v61, %v435_v59  ;;  %v887_v2 = vadd.f32 %v886_v0, %v797_v62 }
 0x162   : > { %997 = vst [vmem:[#allocation2 + $0x10] sm:$0xff] %v965_v1  ;;  %v950_v3 = vadd.f32 %v887_v2, %v420_v63 }
 0x164   : > { %982 = vst [vmem:[#allocation2 + $0xb8] sm:$0xff] %v950_v3  ;;  %v837_v4 = vpop.f32.mrf.mxu2 }
 0x165   : > { %v926_v6 = vpop.f32.mrf.mxu3 }
 0x166   : > { %v927_v7 = vadd.f32 %v926_v6, %v837_v4  ;;  %v800_v8 = vpop.f32.mrf.mxu0 }
 0x167   : > { %v889_v10 = vpop.f32.mrf.mxu1 }
 0x168   : > { %v966_v11 = vadd.f32 %v927_v7, %v436_v5  ;;  %v890_v12 = vadd.f32 %v889_v10, %v800_v8 }
 0x16a   : > { %998 = vst [vmem:[#allocation2 + $0x28] sm:$0xff] %v966_v11  ;;  %v951_v13 = vadd.f32 %v890_v12, %v421_v9 }
 0x16c   : > { %983 = vst [vmem:[#allocation2 + $0x60] sm:$0xff] %v951_v13  ;;  %v840_v14 = vpop.f32.mrf.mxu2 }
 0x16d   : > { %v929_v16 = vpop.f32.mrf.mxu3 }
 0x16e   : > { %v930_v17 = vadd.f32 %v929_v16, %v840_v14  ;;  %v802_v18 = vpop.f32.mrf.mxu0 }
 0x16f   : > { %v891_v20 = vpop.f32.mrf.mxu1 }
 0x170   : > { %v967_v21 = vadd.f32 %v930_v17, %v437_v15  ;;  %v892_v22 = vadd.f32 %v891_v20, %v802_v18 }
 0x172   : > { %999 = vst [vmem:[#allocation2 + $0xa0] sm:$0xff] %v967_v21  ;;  %v952_v23 = vadd.f32 %v892_v22, %v422_v19 }
 0x174   : > { %984 = vst [vmem:[#allocation2 + $0xf0] sm:$0xff] %v952_v23  ;;  %v842_v24 = vpop.f32.mrf.mxu2 }
 0x175   : > { %v931_v26 = vpop.f32.mrf.mxu3 }
 0x176   : > { %v932_v27 = vadd.f32 %v931_v26, %v842_v24  ;;  %v805_v28 = vpop.f32.mrf.mxu0 }
 0x177   : > { %v894_v30 = vpop.f32.mrf.mxu1 }
 0x178   : > { %v968_v31 = vadd.f32 %v932_v27, %v438_v25  ;;  %v895_v32 = vadd.f32 %v894_v30, %v805_v28 }
 0x17a   : > { %1000 = vst [vmem:[#allocation2 + $0xf8] sm:$0xff] %v968_v31  ;;  %v953_v33 = vadd.f32 %v895_v32, %v423_v29 }
 0x17c   : > { %985 = vst [vmem:[#allocation2 + $0x8] sm:$0xff] %v953_v33  ;;  %v845_v34 = vpop.f32.mrf.mxu2 }
 0x17d   : > { %v934_v36 = vpop.f32.mrf.mxu3 }
 0x17e   : > { %v935_v37 = vadd.f32 %v934_v36, %v845_v34  ;;  %v807_v38 = vpop.f32.mrf.mxu0 }
 0x17f   : > { %v896_v40 = vpop.f32.mrf.mxu1 }
 0x180   : > { %v969_v41 = vadd.f32 %v935_v37, %v439_v35  ;;  %v897_v42 = vadd.f32 %v896_v40, %v807_v38 }
 0x182   : > { %1001 = vst [vmem:[#allocation2 + $0x20] sm:$0xff] %v969_v41  ;;  %v954_v43 = vadd.f32 %v897_v42, %v424_v39 }
 0x184   : > { %986 = vst [vmem:[#allocation2 + $0x78] sm:$0xff] %v954_v43  ;;  %v847_v44 = vpop.f32.mrf.mxu2 }
 0x185   : > { %v936_v46 = vpop.f32.mrf.mxu3 }
 0x186   : > { %v937_v47 = vadd.f32 %v936_v46, %v847_v44  ;;  %1006 = sbr.rel (%p1601_p13) target bundleno = 620 (0x26c), region = 78 }
 0x188   : > { %v970_v48 = vadd.f32 %v937_v47, %v440_v45 }
 0x18a   : > { %1002 = vst [vmem:[#allocation2 + $0x98] sm:$0xff] %v970_v48 }
 0x18b   : > { %v1692_v49 = vld [vmem:[%s2252_s2 + $0x38] sm:$0xff]  ;;  %v1691_v50 = vld [vmem:[%s2252_s2 + $0x30] sm:$0xff]  ;;  %v1690_v51 = vld [vmem:[%s2252_s2 + $0x28] sm:$0xff] }
 0x18c   : > { %1151 = vmatpush.bf16.msra.mxu0 %v1692_v49  ;;  %1804 = vmatpush.bf16.msra.mxu1 %v1692_v49  ;;  %v1689_v52 = vld [vmem:[%s2252_s2 + $0x20] sm:$0xff]  ;;  %v1688_v53 = vld [vmem:[%s2252_s2 + $0x18] sm:$0xff]  ;;  %v1687_v54 = vld [vmem:[%s2252_s2 + $0x10] sm:$0xff] }
 0x18d   : > { %1805 = vmatpush.bf16.msra.mxu2 %v1692_v49  ;;  %1806 = vmatpush.bf16.msra.mxu3 %v1692_v49  ;;  %v1686_v55 = vld [vmem:[%s2252_s2 + $0x8] sm:$0xff]  ;;  %v1007_v56 = vld [vmem:[#allocation2 + $0xb0] sm:$0xff]  ;;  %v1008_v57 = vld [vmem:[#allocation2] sm:$0xff] }
 0x18e   : > { %v1015_v58 = vld [vmem:[#allocation2 + $0x80] sm:$0xff]  ;;  %v1016_v59 = vld [vmem:[#allocation2 + $0x88] sm:$0xff]  ;;  %v1023_v60 = vld [vmem:[#allocation2 + $0x38] sm:$0xff]  ;;  %v1039_v0 = vmax.f32 %v1007_v56, 0.0  ;;  %v1040_v1 = vmax.f32 %v1008_v57, 0.0 }
 0x18f   : > { %v1024_v61 = vld [vmem:[#allocation2 + $0x58] sm:$0xff]  ;;  %v1031_v62 = vld [vmem:[#allocation2 + $0xa8] sm:$0xff]  ;;  %v1032_v63 = vld [vmem:[#allocation2 + $0xd0] sm:$0xff]  ;;  %v1047_v2 = vmax.f32 %v1015_v58, 0.0  ;;  %v1048_v3 = vmax.f32 %v1016_v59, 0.0  ;;  %v1055_v5 = vmax.f32 %v1023_v60, 0.0 }
 0x190   : > { %1152 = vmatpush.bf16.msra.mxu0 %v1691_v50  ;;  %1807 = vmatpush.bf16.msra.mxu1 %v1691_v50  ;;  %v1685_v4 = vld [vmem:[%s2252_s2] sm:$0xff]  ;;  %v1056_v6 = vmax.f32 %v1024_v61, 0.0  ;;  %v1063_v7 = vmax.f32 %v1031_v62, 0.0  ;;  %v1064_v8 = vmax.f32 %v1032_v63, 0.0  ;;  %v1071_v9 = vpack.c.bf16 %v1040_v1, %v1039_v0  ;;  %v1009_v13 = vld [vmem:[#allocation2 + $0xd8] sm:$0xff]  ;;  %v1017_v15 = vld [vmem:[#allocation2 + $0xe8] sm:$0xff] }
 0x191   : > { %1808 = vmatpush.bf16.msra.mxu2 %v1691_v50  ;;  %1809 = vmatpush.bf16.msra.mxu3 %v1691_v50  ;;  %v1075_v10 = vpack.c.bf16 %v1048_v3, %v1047_v2  ;;  %v1010_v14 = vld [vmem:[#allocation2 + $0x18] sm:$0xff]  ;;  %v1025_v17 = vld [vmem:[#allocation2 + $0x40] sm:$0xff]  ;;  %v1026_v18 = vld [vmem:[#allocation2 + $0xc8] sm:$0xff]  ;;  %v1041_v21 = vmax.f32 %v1009_v13, 0.0  ;;  %v1049_v23 = vmax.f32 %v1017_v15, 0.0 }
 0x192   : > { %v1079_v11 = vpack.c.bf16 %v1056_v6, %v1055_v5  ;;  %v1083_v12 = vpack.c.bf16 %v1064_v8, %v1063_v7  ;;  %v1018_v16 = vld [vmem:[#allocation2 + $0xb8] sm:$0xff]  ;;  %v1033_v19 = vld [vmem:[#allocation2 + $0x10] sm:$0xff]  ;;  %v1034_v20 = vld [vmem:[#allocation2 + $0x28] sm:$0xff]  ;;  %v1042_v22 = vmax.f32 %v1010_v14, 0.0  ;;  %v1057_v25 = vmax.f32 %v1025_v17, 0.0 }
 0x193   : > { %v1050_v24 = vmax.f32 %v1018_v16, 0.0  ;;  %v1058_v26 = vmax.f32 %v1026_v18, 0.0  ;;  %v1065_v27 = vmax.f32 %v1033_v19, 0.0  ;;  %v1066_v28 = vmax.f32 %v1034_v20, 0.0  ;;  %v1011_v33 = vld [vmem:[#allocation2 + $0x50] sm:$0xff]  ;;  %v1012_v34 = vld [vmem:[#allocation2 + $0x68] sm:$0xff] }
 0x194   : > { %1153 = vmatpush.bf16.msra.mxu0 %v1690_v51  ;;  %1810 = vmatpush.bf16.msra.mxu1 %v1690_v51  ;;  %v1072_v29 = vpack.c.bf16 %v1042_v22, %v1041_v21  ;;  %v1019_v35 = vld [vmem:[#allocation2 + $0x60] sm:$0xff]  ;;  %v1020_v36 = vld [vmem:[#allocation2 + $0xf0] sm:$0xff]  ;;  %v1036_v40 = vld [vmem:[#allocation2 + $0xf8] sm:$0xff]  ;;  %v1043_v41 = vmax.f32 %v1011_v33, 0.0  ;;  %v1044_v42 = vmax.f32 %v1012_v34, 0.0 }
 0x195   : > { %1811 = vmatpush.bf16.msra.mxu2 %v1690_v51  ;;  %1812 = vmatpush.bf16.msra.mxu3 %v1690_v51  ;;  %v1076_v30 = vpack.c.bf16 %v1050_v24, %v1049_v23  ;;  %v1080_v31 = vpack.c.bf16 %v1058_v26, %v1057_v25  ;;  %v1084_v32 = vpack.c.bf16 %v1066_v28, %v1065_v27  ;;  %v1027_v37 = vld [vmem:[#allocation2 + $0xe0] sm:$0xff]  ;;  %v1028_v38 = vld [vmem:[#allocation2 + $0x90] sm:$0xff]  ;;  %v1051_v43 = vmax.f32 %v1019_v35, 0.0  ;;  %v1022_v56 = vld [vmem:[#allocation2 + $0x78] sm:$0xff] }
 0x196   : > { %v1035_v39 = vld [vmem:[#allocation2 + $0xa0] sm:$0xff]  ;;  %v1052_v44 = vmax.f32 %v1020_v36, 0.0  ;;  %v1059_v45 = vmax.f32 %v1027_v37, 0.0  ;;  %v1060_v46 = vmax.f32 %v1028_v38, 0.0  ;;  %v1068_v48 = vmax.f32 %v1036_v40, 0.0  ;;  %v1029_v57 = vld [vmem:[#allocation2 + $0x70] sm:$0xff] }
 0x197   : > { %v1067_v47 = vmax.f32 %v1035_v39, 0.0  ;;  %v1073_v49 = vpack.c.bf16 %v1044_v42, %v1043_v41  ;;  %v1030_v58 = vld [vmem:[#allocation2 + $0xc0] sm:$0xff]  ;;  %v1038_v60 = vld [vmem:[#allocation2 + $0x98] sm:$0xff]  ;;  %v1054_v0 = vmax.f32 %v1022_v56, 0.0  ;;  %v1061_v1 = vmax.f32 %v1029_v57, 0.0 }
 0x198   : > { %1154 = vmatpush.bf16.msra.mxu0 %v1689_v52  ;;  %1813 = vmatpush.bf16.msra.mxu1 %v1689_v52  ;;  %v1077_v50 = vpack.c.bf16 %v1052_v44, %v1051_v43  ;;  %v1081_v51 = vpack.c.bf16 %v1060_v46, %v1059_v45  ;;  %v1037_v59 = vld [vmem:[#allocation2 + $0x20] sm:$0xff]  ;;  %v1062_v2 = vmax.f32 %v1030_v58, 0.0 }
 0x199   : > { %1814 = vmatpush.bf16.msra.mxu2 %v1689_v52  ;;  %1815 = vmatpush.bf16.msra.mxu3 %v1689_v52  ;;  %v1085_v52 = vpack.c.bf16 %v1068_v48, %v1067_v47  ;;  %v1069_v3 = vmax.f32 %v1037_v59, 0.0 }
 0x19a   : > { %v1082_v7 = vpack.c.bf16 %v1062_v2, %v1061_v1 }
 0x19c   : > { %1155 = vmatpush.bf16.msra.mxu0 %v1688_v53  ;;  %1816 = vmatpush.bf16.msra.mxu1 %v1688_v53 }
 0x19d   : > { %1817 = vmatpush.bf16.msra.mxu2 %v1688_v53  ;;  %1818 = vmatpush.bf16.msra.mxu3 %v1688_v53  ;;  %v1013_v53 = vld [vmem:[#allocation2 + $0x30] sm:$0xff] }
 0x19e   : > { %v1045_v61 = vmax.f32 %v1013_v53, 0.0 }
 0x1a0   : > { %1156 = vmatpush.bf16.msra.mxu0 %v1687_v54  ;;  %1819 = vmatpush.bf16.msra.mxu1 %v1687_v54 }
 0x1a1   : > { %1820 = vmatpush.bf16.msra.mxu2 %v1687_v54  ;;  %1821 = vmatpush.bf16.msra.mxu3 %v1687_v54  ;;  %v1014_v54 = vld [vmem:[#allocation2 + $0x48] sm:$0xff] }
 0x1a2   : > { %v1046_v62 = vmax.f32 %v1014_v54, 0.0 }
 0x1a4   : > { %1157 = vmatpush.bf16.msra.mxu0 %v1686_v55  ;;  %1822 = vmatpush.bf16.msra.mxu1 %v1686_v55  ;;  %v1074_v5 = vpack.c.bf16 %v1046_v62, %v1045_v61 }
 0x1a5   : > { %1823 = vmatpush.bf16.msra.mxu2 %v1686_v55  ;;  %1824 = vmatpush.bf16.msra.mxu3 %v1686_v55  ;;  %v1021_v55 = vld [vmem:[#allocation2 + $0x8] sm:$0xff] }
 0x1a6   : > { %v1053_v63 = vmax.f32 %v1021_v55, 0.0 }
 0x1a8   : > { %1158 = vmatpush.bf16.msra.mxu0 %v1685_v4  ;;  %1825 = vmatpush.bf16.msra.mxu1 %v1685_v4  ;;  %v1078_v6 = vpack.c.bf16 %v1054_v0, %v1053_v63 }
 0x1a9   : > { %1826 = vmatpush.bf16.msra.mxu2 %v1685_v4  ;;  %1827 = vmatpush.bf16.msra.mxu3 %v1685_v4  ;;  %v1070_v4 = vmax.f32 %v1038_v60, 0.0 }
 0x1ab   : > { %1159 = vmatmul.bf16.vlgmr.msra.gmra.mxu0 %v1071_v9  ;;  %1179 = vmatmul.bf16.vlgmr.msra.gmra.mxu1 %v1075_v10  ;;  %v1086_v8 = vpack.c.bf16 %v1070_v4, %v1069_v3 }
 0x1ac   : > { %1199 = vmatmul.bf16.vlgmr.msra.gmra.mxu2 %v1079_v11  ;;  %1219 = vmatmul.bf16.vlgmr.msra.gmra.mxu3 %v1083_v12 }
 0x1bb   : > { %1164 = vmatmul.bf16.gmra.mxu0 %v1072_v29  ;;  %1184 = vmatmul.bf16.gmra.mxu1 %v1076_v30 }
 0x1bc   : > { %1204 = vmatmul.bf16.gmra.mxu2 %v1080_v31  ;;  %1224 = vmatmul.bf16.gmra.mxu3 %v1084_v32 }
 0x1cb   : > { %1169 = vmatmul.bf16.gmra.mxu0 %v1073_v49  ;;  %1189 = vmatmul.bf16.gmra.mxu1 %v1077_v50 }
 0x1cc   : > { %1209 = vmatmul.bf16.gmra.mxu2 %v1081_v51  ;;  %1229 = vmatmul.bf16.gmra.mxu3 %v1085_v52 }
 0x1db   : > { %1174 = vmatmul.bf16.gmra.mxu0 %v1074_v5  ;;  %1194 = vmatmul.bf16.gmra.mxu1 %v1078_v6 }
 0x1dc   : > { %1214 = vmatmul.bf16.gmra.mxu2 %v1082_v7  ;;  %1234 = vmatmul.bf16.gmra.mxu3 %v1086_v8 }
 0x228   : > { %v1160_v9 = vpop.f32.mrf.mxu0  ;;  %v1180_v10 = vpop.f32.mrf.mxu1 }
 0x22f   : > { %v1200_v11 = vpop.f32.mrf.mxu2  ;;  %v1220_v12 = vpop.f32.mrf.mxu3 }
 0x230   : > { %v1162_v13 = vpop.f32.mrf.mxu0  ;;  %v1182_v14 = vpop.f32.mrf.mxu1 }
 0x231   : > { %v1696_v15 = vpack.c.bf16 %v1162_v13, %v1160_v9  ;;  %v1716_v16 = vpack.c.bf16 %v1182_v14, %v1180_v10 }
 0x233   : > { %1697 = vst [vmem:[%s2103_s30] sm:$0xff] %v1696_v15  }
 0x234   : > { %1776 = vst [vmem:[%s2103_s30 + $0x20] sm:$0xff] %v1716_v16  }
 0x237   : > { %v1202_v17 = vpop.f32.mrf.mxu2  ;;  %v1222_v18 = vpop.f32.mrf.mxu3 }
 0x238   : > { %v1736_v19 = vpack.c.bf16 %v1202_v17, %v1200_v11  ;;  %v1756_v20 = vpack.c.bf16 %v1222_v18, %v1220_v12  ;;  %v1165_v21 = vpop.f32.mrf.mxu0  ;;  %v1185_v22 = vpop.f32.mrf.mxu1 }
 0x23a   : > { %1780 = vst [vmem:[%s2103_s30 + $0x40] sm:$0xff] %v1736_v19  }
 0x23b   : > { %1784 = vst [vmem:[%s2103_s30 + $0x60] sm:$0xff] %v1756_v20  }
 0x23f   : > { %v1205_v23 = vpop.f32.mrf.mxu2  ;;  %v1225_v24 = vpop.f32.mrf.mxu3 }
 0x240   : > { %v1167_v25 = vpop.f32.mrf.mxu0  ;;  %v1187_v26 = vpop.f32.mrf.mxu1 }
 0x241   : > { %v1701_v27 = vpack.c.bf16 %v1167_v25, %v1165_v21  ;;  %v1721_v28 = vpack.c.bf16 %v1187_v26, %v1185_v22 }
 0x243   : > { %1773 = vst [vmem:[%s2103_s30 + $0x8] sm:$0xff] %v1701_v27  }
 0x244   : > { %1777 = vst [vmem:[%s2103_s30 + $0x28] sm:$0xff] %v1721_v28  }
 0x247   : > { %v1207_v29 = vpop.f32.mrf.mxu2  ;;  %v1227_v30 = vpop.f32.mrf.mxu3 }
 0x248   : > { %v1741_v31 = vpack.c.bf16 %v1207_v29, %v1205_v23  ;;  %v1761_v32 = vpack.c.bf16 %v1227_v30, %v1225_v24  ;;  %v1170_v33 = vpop.f32.mrf.mxu0  ;;  %v1190_v34 = vpop.f32.mrf.mxu1 }
 0x24a   : > { %1781 = vst [vmem:[%s2103_s30 + $0x48] sm:$0xff] %v1741_v31  }
 0x24b   : > { %1785 = vst [vmem:[%s2103_s30 + $0x68] sm:$0xff] %v1761_v32  }
 0x24f   : > { %v1210_v35 = vpop.f32.mrf.mxu2  ;;  %v1230_v36 = vpop.f32.mrf.mxu3 }
 0x250   : > { %v1172_v37 = vpop.f32.mrf.mxu0  ;;  %v1192_v38 = vpop.f32.mrf.mxu1 }
 0x251   : > { %v1706_v39 = vpack.c.bf16 %v1172_v37, %v1170_v33  ;;  %v1726_v40 = vpack.c.bf16 %v1192_v38, %v1190_v34 }
 0x253   : > { %1774 = vst [vmem:[%s2103_s30 + $0x10] sm:$0xff] %v1706_v39  }
 0x254   : > { %1778 = vst [vmem:[%s2103_s30 + $0x30] sm:$0xff] %v1726_v40  }
 0x257   : > { %v1212_v41 = vpop.f32.mrf.mxu2  ;;  %v1232_v42 = vpop.f32.mrf.mxu3 }
 0x258   : > { %v1746_v43 = vpack.c.bf16 %v1212_v41, %v1210_v35  ;;  %v1766_v44 = vpack.c.bf16 %v1232_v42, %v1230_v36  ;;  %v1175_v45 = vpop.f32.mrf.mxu0  ;;  %v1195_v46 = vpop.f32.mrf.mxu1 }
 0x25a   : > { %1782 = vst [vmem:[%s2103_s30 + $0x50] sm:$0xff] %v1746_v43  }
 0x25b   : > { %1786 = vst [vmem:[%s2103_s30 + $0x70] sm:$0xff] %v1766_v44  }
 0x25f   : > { %v1215_v47 = vpop.f32.mrf.mxu2  ;;  %v1235_v48 = vpop.f32.mrf.mxu3 }
 0x260   : > { %v1177_v49 = vpop.f32.mrf.mxu0  ;;  %v1197_v50 = vpop.f32.mrf.mxu1 }
 0x261   : > { %v1711_v51 = vpack.c.bf16 %v1177_v49, %v1175_v45  ;;  %v1731_v52 = vpack.c.bf16 %v1197_v50, %v1195_v46 }
 0x263   : > { %1775 = vst [vmem:[%s2103_s30 + $0x18] sm:$0xff] %v1711_v51  }
 0x264   : > { %1779 = vst [vmem:[%s2103_s30 + $0x38] sm:$0xff] %v1731_v52  }
 0x267   : > { %v1217_v53 = vpop.f32.mrf.mxu2  ;;  %v1237_v54 = vpop.f32.mrf.mxu3 }
 0x268   : > { %v1751_v55 = vpack.c.bf16 %v1217_v53, %v1215_v47  ;;  %v1771_v56 = vpack.c.bf16 %v1237_v54, %v1235_v48 }
 0x26a   : > { %1783 = vst [vmem:[%s2103_s30 + $0x58] sm:$0xff] %v1751_v55  }
 0x26b   : > { %1787 = vst [vmem:[%s2103_s30 + $0x78] sm:$0xff] %v1771_v56  }
 0x26c PF: > { %s13_s18 = sadd.s32 1, %s1939_s18   ;;  %s2254_s12 = smov %s1919_s13 }
 0x26d   : > { %p10_p0 = scmp.ge.s32.totalorder %s13_s18, 6   ;;  %s2255_s13 = smov %s2013_s25 }
 0x26e   : > { %s2256_s14 = smov %s1931_s16  ;;  %s2257_s15 = smov %s1935_s17 }
 0x26f   : > { %s2258_s16 = smov %s2261_s19  ;;  %s2259_s17 = smov %s2265_s20 }
 0x270   :  { %12 = sbr.rel (!%p10_p0) target bundleno = 4 (0x4), region = 116 }

</bundles_post_ra>
